<compile_context>
chip_gen: v7x
topology: tpu7x:2x2x1
jax: 0.10.0
libtpu: 0.0.40
codegen_flags: <defaults>
</compile_context>

<pallas_src>
import math
import functools

import jax
import jax.numpy as jnp
from jax import lax
from jax.experimental import pallas as pl
from jax.experimental.pallas import tpu as pltpu


# ---------------------------------------------------------------------------
# Fused encoder kernel: grid = (batch_tile, layer)
# ---------------------------------------------------------------------------
def encoder_kernel(
    x_ref,       # (Bt, L, D) f32   input activations (read at layer 0 only)
    pe_ref,      # (L, D)     f32   positional-encoding table
    maskb_ref,   # (Bt, L)    f32   additive key bias (0 or -1e9)
    wqkv_ref,    # (D, 3D)    bf16  fused [Wq | Wk | Wv]^T  (layer-sliced)
    wo_ref,      # (D, D)     bf16  output projection (= W^T)
    w1_ref,      # (D, F)     bf16  FFN linear1 (= W^T)
    w2_ref,      # (F, D)     bf16  FFN linear2 (= W^T)
    vec_ref,     # (8, W)     f32   small-vector slab (biases + LN params)
    o_ref,       # (Bt, L, D) f32   output (written at last layer)
    x_scr,       # (Bt*L, D)  f32   VMEM scratch: residual stream
    *,
    nhead: int,
):
    layer = pl.program_id(1)
    Bt, L, D = x_ref.shape
    F = w1_ref.shape[-1]
    M = Bt * L
    dh = D // nhead
    eps = jnp.float32(1e-5)
    scale = jnp.float32(1.0 / math.sqrt(dh))
    bf = jnp.bfloat16

    @pl.when(layer == 0)
    def _():
        # Fold the positional-encoding add into the first layer iteration;
        # flatten (Bt, L) -> M rows so all matmuls see a tall M dimension.
        x_scr[...] = (x_ref[...] + pe_ref[...]).reshape(M, D)

    x = x_scr[...]                                   # (M, D) f32
    x_bf = x.astype(bf)                              # single cast, reused

    # ----- per-layer small-vector slab (one DMA per layer) -----
    bqkv = vec_ref[0:1, 0:3 * D]                     # (1, 3D)
    b1   = vec_ref[1:2, 0:F]                         # (1, F)
    bo   = vec_ref[2:3, 0:D]                         # (1, D)
    b2   = vec_ref[3:4, 0:D]
    ln1g = vec_ref[4:5, 0:D]
    ln1b = vec_ref[5:6, 0:D]
    ln2g = vec_ref[6:7, 0:D]
    ln2b = vec_ref[7:8, 0:D]

    # ----- fused Q/K/V projection: one (M, D) @ (D, 3D) matmul -----
    qkv = jnp.dot(x_bf, wqkv_ref[...],
                  preferred_element_type=jnp.float32) + bqkv      # (M, 3D) f32
    q_bf = (qkv[:, 0:D] * scale).astype(bf)          # scale folded in once
    kv_bf = qkv[:, D:3 * D].astype(bf)               # k|v cast once

    mask_all = maskb_ref[...]                        # (Bt, L) f32

    # ----- multi-head self attention (post-norm TransformerEncoderLayer) -----
    rows = []
    for b in range(Bt):                              # Bt, nhead small & static
        key_bias = mask_all[b:b + 1, :]              # (1, L) broadcast over queries
        r0 = b * L
        heads = []
        for h in range(nhead):
            qh = q_bf[r0:r0 + L, h * dh:(h + 1) * dh]
            kh = kv_bf[r0:r0 + L, h * dh:(h + 1) * dh]
            vh = kv_bf[r0:r0 + L, D + h * dh:D + (h + 1) * dh]
            # q @ k^T without an explicit transpose (contract last dims)
            s = lax.dot_general(qh, kh, (((1,), (1,)), ((), ())),
                                preferred_element_type=jnp.float32)
            s = s + key_bias                         # key-padding mask (f32)
            s = s - jnp.max(s, axis=-1, keepdims=True)
            p = jnp.exp(s)
            p = p * pl.reciprocal(jnp.sum(p, axis=-1, keepdims=True), approx=True)
            heads.append(jnp.dot(p.astype(bf), vh,
                                 preferred_element_type=jnp.float32).astype(bf))
        rows.append(jnp.concatenate(heads, axis=-1))  # (L, D) bf16
    heads_cat = jnp.concatenate(rows, axis=0)         # (M, D) bf16

    attn = jnp.dot(heads_cat, wo_ref[...],
                   preferred_element_type=jnp.float32) + bo       # (M, D) f32

    # ----- residual + LayerNorm 1 (f32) -----
    y = x + attn
    mu = jnp.mean(y, axis=-1, keepdims=True)
    var = jnp.mean((y - mu) * (y - mu), axis=-1, keepdims=True)
    y = (y - mu) * lax.rsqrt(var + eps) * ln1g + ln1b

    # ----- feed-forward (ReLU), bf16 matmuls / f32 accumulation -----
    h1 = jnp.maximum(jnp.dot(y.astype(bf), w1_ref[...],
                             preferred_element_type=jnp.float32) + b1, 0.0)
    h2 = jnp.dot(h1.astype(bf), w2_ref[...],
                 preferred_element_type=jnp.float32) + b2

    # ----- residual + LayerNorm 2 (f32) -----
    z = y + h2
    mu2 = jnp.mean(z, axis=-1, keepdims=True)
    var2 = jnp.mean((z - mu2) * (z - mu2), axis=-1, keepdims=True)
    z = (z - mu2) * lax.rsqrt(var2 + eps) * ln2g + ln2b

    x_scr[...] = z                                   # carry to next layer

    @pl.when(layer == pl.num_programs(1) - 1)
    def _():
        o_ref[...] = z.reshape(Bt, L, D).astype(o_ref.dtype)


# ---------------------------------------------------------------------------
# Wrapper
# ---------------------------------------------------------------------------
def transformer_encoder(x, packed, pe, *, nhead, src_key_padding_mask=None,
                        num_batch_tiles=1):
    """x: (B, L, D) f32; src_key_padding_mask: (B, L), 1 = masked token.

    num_batch_tiles=1 (default) streams each layer's weights once for the
    whole batch (best on v5e/v6e); set to 2 on v7x to use both TensorCores.
    """
    B, L, D = x.shape
    NL = packed["wqkv"].shape[0]
    F = packed["w1"].shape[-1]
    W = packed["vec"].shape[-1]
    assert B % num_batch_tiles == 0
    Bt = B // num_batch_tiles

    if src_key_padding_mask is None:
        maskb = jnp.zeros((B, L), jnp.float32)
    else:
        maskb = src_key_padding_mask.astype(jnp.float32) * jnp.float32(-1e9)

    def per_layer(shape):
        # stacked along a leading layer axis; that axis is squeezed in-kernel
        n = len(shape)
        return pl.BlockSpec((None,) + shape, lambda bt, l, _n=n: (l,) + (0,) * _n)

    in_specs = [
        pl.BlockSpec((Bt, L, D), lambda bt, l: (bt, 0, 0)),   # x
        pl.BlockSpec((L, D), lambda bt, l: (0, 0)),           # pe
        pl.BlockSpec((Bt, L), lambda bt, l: (bt, 0)),         # mask bias
        per_layer((D, 3 * D)),                                # fused Wqkv
        per_layer((D, D)),                                    # Wo
        per_layer((D, F)),                                    # W1
        per_layer((F, D)),                                    # W2
        per_layer((8, W)),                                    # bias/LN slab
    ]

    # TODO(synk): at production dims (e.g. D=1024, F=4096) set vmem_limit_bytes
    # explicitly and/or tile the FFN weights so double-buffering fits v7x's
    # 64 MiB VMEM; unnecessary at these toy sizes (<1 MiB of weights/layer).
    return pl.pallas_call(
        functools.partial(encoder_kernel, nhead=nhead),
        out_shape=jax.ShapeDtypeStruct((B, L, D), jnp.float32),
        grid=(num_batch_tiles, NL),
        in_specs=in_specs,
        out_specs=pl.BlockSpec((Bt, L, D), lambda bt, l: (bt, 0, 0)),
        scratch_shapes=[pltpu.VMEM((Bt * L, D), jnp.float32)],
        compiler_params=pltpu.CompilerParams(
            dimension_semantics=("parallel", "arbitrary")),
    )(x, pe, maskb,
      packed["wqkv"], packed["wo"], packed["w1"], packed["w2"], packed["vec"])


def make_positional_encoding(L, D):
    pos = jnp.arange(L, dtype=jnp.float32)[:, None]
    div = jnp.exp(jnp.arange(0, D, 2, dtype=jnp.float32) * (-math.log(10000.0) / D))
    pe = jnp.zeros((L, D), jnp.float32)
    pe = pe.at[:, 0::2].set(jnp.sin(pos * div))
    pe = pe.at[:, 1::2].set(jnp.cos(pos * div))
    return pe


# ---------------------------------------------------------------------------
# Deterministic parameter init + packing
# ---------------------------------------------------------------------------
def init_layer_params(key, D, F):
    ks = jax.random.split(key, 4)

    def xavier(k, shape):
        fan_out, fan_in = shape
        return jax.random.normal(k, shape, jnp.float32) * math.sqrt(2.0 / (fan_in + fan_out))

    w_in = xavier(ks[0], (3 * D, D))                 # in_proj_weight (3D, D)
    return {
        "wq_t": w_in[0 * D:1 * D].T, "wk_t": w_in[1 * D:2 * D].T, "wv_t": w_in[2 * D:3 * D].T,
        "bq": jnp.zeros((D,), jnp.float32),
        "bk": jnp.zeros((D,), jnp.float32),
        "bv": jnp.zeros((D,), jnp.float32),
        "wo_t": xavier(ks[1], (D, D)).T,
        "bo": jnp.zeros((D,), jnp.float32),
        "ln1_g": jnp.ones((D,), jnp.float32), "ln1_b": jnp.zeros((D,), jnp.float32),
        "w1_t": xavier(ks[2], (F, D)).T,             # (D, F)
        "b1": jnp.zeros((F,), jnp.float32),
        "w2_t": xavier(ks[3], (D, F)).T,             # (F, D)
        "b2": jnp.zeros((D,), jnp.float32),
        "ln2_g": jnp.ones((D,), jnp.float32), "ln2_b": jnp.zeros((D,), jnp.float32),
    }


def pack_params(layer_params, D, F):
    """Stack per-layer params along a leading layer axis.

    - Wq/Wk/Wv fused into one (D, 3D) bf16 weight per layer.
    - All biases + LayerNorm vectors packed into one (8, max(3D,F)) f32 slab.
    """
    bf = jnp.bfloat16
    W = max(3 * D, F)

    wqkv = jnp.stack([jnp.concatenate([p["wq_t"], p["wk_t"], p["wv_t"]], axis=1)
                      for p in layer_params]).astype(bf)           # (NL, D, 3D)
    wo = jnp.stack([p["wo_t"] for p in layer_params]).astype(bf)   # (NL, D, D)
    w1 = jnp.stack([p["w1_t"] for p in layer_params]).astype(bf)   # (NL, D, F)
    w2 = jnp.stack([p["w2_t"] for p in layer_params]).astype(bf)   # (NL, F, D)

    vecs = []
    for p in layer_params:
        slab = jnp.zeros((8, W), jnp.float32)
        slab = slab.at[0, :3 * D].set(jnp.concatenate([p["bq"], p["bk"], p["bv"]]))
        slab = slab.at[1, :F].set(p["b1"])
        slab = slab.at[2, :D].set(p["bo"])
        slab = slab.at[3, :D].set(p["b2"])
        slab = slab.at[4, :D].set(p["ln1_g"])
        slab = slab.at[5, :D].set(p["ln1_b"])
        slab = slab.at[6, :D].set(p["ln2_g"])
        slab = slab.at[7, :D].set(p["ln2_b"])
        vecs.append(slab)
    vec = jnp.stack(vecs)                                           # (NL, 8, W)

    return {"wqkv": wqkv, "wo": wo, "w1": w1, "w2": w2, "vec": vec}


# ---------------------------------------------------------------------------
# Pure-JAX reference with matching mixed precision (bf16 matmuls, f32 accum)
# ---------------------------------------------------------------------------
def reference_forward(x, layer_params, pe, *, nhead, src_key_padding_mask=None):
    B, L, D = x.shape
    dh = D // nhead
    eps = 1e-5
    scale = jnp.float32(1.0 / math.sqrt(dh))
    bf = jnp.bfloat16

    def mm(a, w, b):
        return jnp.einsum("...k,kn->...n", a.astype(bf), w.astype(bf),
                          preferred_element_type=jnp.float32) + b

    x = x + pe[None]
    if src_key_padding_mask is None:
        bias = jnp.zeros((B, L), jnp.float32)
    else:
        bias = src_key_padding_mask.astype(jnp.float32) * jnp.float32(-1e9)

    for p in layer_params:
        q = mm(x, p["wq_t"], p["bq"])
        k = mm(x, p["wk_t"], p["bk"])
        v = mm(x, p["wv_t"], p["bv"])
        qh = q.reshape(B, L, nhead, dh).transpose(0, 2, 1, 3)
        kh = k.reshape(B, L, nhead, dh).transpose(0, 2, 1, 3)
        vh = v.reshape(B, L, nhead, dh).transpose(0, 2, 1, 3)
        s = jnp.einsum("bhqd,bhkd->bhqk", qh.astype(bf), kh.astype(bf),
                       preferred_element_type=jnp.float32) * scale
        s = s + bias[:, None, None, :]
        pr = jax.nn.softmax(s, axis=-1)
        o = jnp.einsum("bhqk,bhkd->bhqd", pr.astype(bf), vh.astype(bf),
                       preferred_element_type=jnp.float32)
        o = o.transpose(0, 2, 1, 3).reshape(B, L, D)
        attn = mm(o, p["wo_t"], p["bo"])
        y = x + attn
        mu = y.mean(-1, keepdims=True)
        var = ((y - mu) ** 2).mean(-1, keepdims=True)
        y = (y - mu) * lax.rsqrt(var + eps) * p["ln1_g"] + p["ln1_b"]
        h1 = jnp.maximum(mm(y, p["w1_t"], p["b1"]), 0.0)
        h2 = mm(h1, p["w2_t"], p["b2"])
        z = y + h2
        mu2 = z.mean(-1, keepdims=True)
        var2 = ((z - mu2) ** 2).mean(-1, keepdims=True)
        x = (z - mu2) * lax.rsqrt(var2 + eps) * p["ln2_g"] + p["ln2_b"]
    return x


# ---------------------------------------------------------------------------
if __name__ == "__main__":
    # Small but TPU-friendly shapes: D lane-aligned to 128.
    B, L, D, NHEAD, NLAYERS, FFN = 2, 16, 128, 4, 2, 256

    key = jax.random.PRNGKey(0)
    kx, kp = jax.random.split(key)
    layer_keys = jax.random.split(kp, NLAYERS)
    layer_params = [init_layer_params(layer_keys[i], D, FFN) for i in range(NLAYERS)]
    packed = pack_params(layer_params, D, FFN)

    pe = make_positional_encoding(L, D)              # hoisted: computed once
    x = jax.random.normal(kx, (B, L, D), jnp.float32)
    # key-padding mask: last 3 tokens of batch element 1 are masked (1 = masked)
    mask = jnp.zeros((B, L), jnp.float32).at[1, L - 3:].set(1.0)

    # TODO(synk): dropout layers are identity here (eval-mode semantics).
    out = transformer_encoder(x, packed, pe, nhead=NHEAD, src_key_padding_mask=mask)
    out = jax.block_until_ready(out)

    ref = reference_forward(x, layer_params, pe, nhead=NHEAD, src_key_padding_mask=mask)
    assert out.shape == (B, L, D)
    max_err = float(jnp.max(jnp.abs(out - ref)))
    assert bool(jnp.allclose(out, ref, atol=2e-2, rtol=2e-2)), \
        f"mismatch vs reference (max abs err {max_err})"

    print("KERNEL_OK")
</pallas_src>

<mosaic_0001>
module attributes {stable_mosaic.version = 11 : i64} {
  func.func @encoder_kernel(%arg0: i32, %arg1: i32, %arg2: memref<2x16x128xf32, #tpu.memory_space<vmem>>, %arg3: memref<16x128xf32, #tpu.memory_space<vmem>>, %arg4: memref<2x16xf32, #tpu.memory_space<vmem>>, %arg5: memref<1x128x384xbf16, #tpu.memory_space<vmem>>, %arg6: memref<1x128x128xbf16, #tpu.memory_space<vmem>>, %arg7: memref<1x128x256xbf16, #tpu.memory_space<vmem>>, %arg8: memref<1x256x128xbf16, #tpu.memory_space<vmem>>, %arg9: memref<1x8x384xf32, #tpu.memory_space<vmem>>, %arg10: memref<2x16x128xf32, #tpu.memory_space<vmem>>, %arg11: memref<32x128xf32, #tpu.memory_space<vmem>>) attributes {dimension_semantics = [#tpu.dimension_semantics<parallel>, #tpu.dimension_semantics<arbitrary>], iteration_bounds = array<i64: 1, 2>, scalar_prefetch = 0 : i64, scratch_operands = 1 : i64, tpu.core_type = #tpu.core_type<tc>, window_params = [{transform_indices = @transform_0, window_bounds = array<i64: 2, 16, 128>}, {pipeline_mode = #tpu.pipeline_mode<synchronous>, transform_indices = @transform_1, window_bounds = array<i64: 16, 128>}, {transform_indices = @transform_2, window_bounds = array<i64: 2, 16>}, {transform_indices = @transform_3, window_bounds = array<i64: 1, 128, 384>}, {transform_indices = @transform_4, window_bounds = array<i64: 1, 128, 128>}, {transform_indices = @transform_5, window_bounds = array<i64: 1, 128, 256>}, {transform_indices = @transform_6, window_bounds = array<i64: 1, 256, 128>}, {transform_indices = @transform_7, window_bounds = array<i64: 1, 8, 384>}, {transform_indices = @transform_8, window_bounds = array<i64: 2, 16, 128>}]} {
    %c0_i32 = arith.constant 0 : i32
    %0 = arith.cmpi eq, %arg1, %c0_i32 : i32
    %1 = arith.extui %0 : i1 to i32
    %c0_i32_0 = arith.constant 0 : i32
    %2 = arith.cmpi ne, %1, %c0_i32_0 : i32
    scf.if %2 {
      %c0_83 = arith.constant 0 : index
      %c0_84 = arith.constant 0 : index
      %c0_85 = arith.constant 0 : index
      %263 = vector.load %arg2[%c0_83, %c0_84, %c0_85] : memref<2x16x128xf32, #tpu.memory_space<vmem>>, vector<2x16x128xf32>
      %c0_86 = arith.constant 0 : index
      %c0_87 = arith.constant 0 : index
      %264 = vector.load %arg3[%c0_86, %c0_87] : memref<16x128xf32, #tpu.memory_space<vmem>>, vector<16x128xf32>
      %265 = vector.shape_cast %264 : vector<16x128xf32> to vector<1x16x128xf32>
      %266 = vector.broadcast %265 : vector<1x16x128xf32> to vector<2x16x128xf32>
      %267 = arith.addf %263, %266 : vector<2x16x128xf32>
      %268 = vector.shape_cast %267 : vector<2x16x128xf32> to vector<32x128xf32>
      %c0_88 = arith.constant 0 : index
      %c0_89 = arith.constant 0 : index
      %269 = vector.load %arg11[%c0_88, %c0_89] : memref<32x128xf32, #tpu.memory_space<vmem>>, vector<32x128xf32>
      tpu.vector_store %arg11[%c0_88, %c0_89], %268 {strides = array<i32>} : memref<32x128xf32, #tpu.memory_space<vmem>>, vector<32x128xf32>,
    } else {
    }
    %c0 = arith.constant 0 : index
    %c0_1 = arith.constant 0 : index
    %3 = vector.load %arg11[%c0, %c0_1] : memref<32x128xf32, #tpu.memory_space<vmem>>, vector<32x128xf32>
    %4 = arith.truncf %3 : vector<32x128xf32> to vector<32x128xbf16>
    %c0_2 = arith.constant 0 : index
    %c0_3 = arith.constant 0 : index
    %c0_4 = arith.constant 0 : index
    %5 = vector.load %arg9[%c0_2, %c0_3, %c0_4] : memref<1x8x384xf32, #tpu.memory_space<vmem>>, vector<1x1x384xf32>
    %6 = vector.shape_cast %5 : vector<1x1x384xf32> to vector<1x384xf32>
    %c0_5 = arith.constant 0 : index
    %c1 = arith.constant 1 : index
    %c0_6 = arith.constant 0 : index
    %7 = vector.load %arg9[%c0_5, %c1, %c0_6] : memref<1x8x384xf32, #tpu.memory_space<vmem>>, vector<1x1x256xf32>
    %8 = vector.shape_cast %7 : vector<1x1x256xf32> to vector<1x256xf32>
    %c0_7 = arith.constant 0 : index
    %c2 = arith.constant 2 : index
    %c0_8 = arith.constant 0 : index
    %9 = vector.load %arg9[%c0_7, %c2, %c0_8] : memref<1x8x384xf32, #tpu.memory_space<vmem>>, vector<1x1x128xf32>
    %10 = vector.shape_cast %9 : vector<1x1x128xf32> to vector<1x128xf32>
    %c0_9 = arith.constant 0 : index
    %c3 = arith.constant 3 : index
    %c0_10 = arith.constant 0 : index
    %11 = vector.load %arg9[%c0_9, %c3, %c0_10] : memref<1x8x384xf32, #tpu.memory_space<vmem>>, vector<1x1x128xf32>
    %12 = vector.shape_cast %11 : vector<1x1x128xf32> to vector<1x128xf32>
    %c0_11 = arith.constant 0 : index
    %c4 = arith.constant 4 : index
    %c0_12 = arith.constant 0 : index
    %13 = vector.load %arg9[%c0_11, %c4, %c0_12] : memref<1x8x384xf32, #tpu.memory_space<vmem>>, vector<1x1x128xf32>
    %14 = vector.shape_cast %13 : vector<1x1x128xf32> to vector<1x128xf32>
    %c0_13 = arith.constant 0 : index
    %c5 = arith.constant 5 : index
    %c0_14 = arith.constant 0 : index
    %15 = vector.load %arg9[%c0_13, %c5, %c0_14] : memref<1x8x384xf32, #tpu.memory_space<vmem>>, vector<1x1x128xf32>
    %16 = vector.shape_cast %15 : vector<1x1x128xf32> to vector<1x128xf32>
    %c0_15 = arith.constant 0 : index
    %c6 = arith.constant 6 : index
    %c0_16 = arith.constant 0 : index
    %17 = vector.load %arg9[%c0_15, %c6, %c0_16] : memref<1x8x384xf32, #tpu.memory_space<vmem>>, vector<1x1x128xf32>
    %18 = vector.shape_cast %17 : vector<1x1x128xf32> to vector<1x128xf32>
    %c0_17 = arith.constant 0 : index
    %c7 = arith.constant 7 : index
    %c0_18 = arith.constant 0 : index
    %19 = vector.load %arg9[%c0_17, %c7, %c0_18] : memref<1x8x384xf32, #tpu.memory_space<vmem>>, vector<1x1x128xf32>
    %20 = vector.shape_cast %19 : vector<1x1x128xf32> to vector<1x128xf32>
    %c0_19 = arith.constant 0 : index
    %c0_20 = arith.constant 0 : index
    %c0_21 = arith.constant 0 : index
    %21 = vector.load %arg5[%c0_19, %c0_20, %c0_21] : memref<1x128x384xbf16, #tpu.memory_space<vmem>>, vector<1x128x384xbf16>
    %22 = vector.shape_cast %21 : vector<1x128x384xbf16> to vector<128x384xbf16>
    %cst = arith.constant dense<0.000000e+00> : vector<32x384xf32>
    %23 = tpu.matmul %4, %22, %cst {dimension_numbers = #tpu.dot_dimension_numbers<[1], [0], [0], [1], [0, 0, 1, 1], [], []>} : vector<32x128xbf16>, vector<128x384xbf16>, vector<32x384xf32> -> vector<32x384xf32>
    %24 = vector.broadcast %6 : vector<1x384xf32> to vector<32x384xf32>
    %25 = arith.addf %23, %24 : vector<32x384xf32>
    %26 = vector.extract_strided_slice %25 {offsets = [0, 0], sizes = [32, 128], strides = [1, 1]} : vector<32x384xf32> to vector<32x128xf32>
    %cst_22 = arith.constant 0.176776692 : f32
    %27 = vector.broadcast %cst_22 : f32 to vector<32x128xf32>
    %28 = arith.mulf %26, %27 : vector<32x128xf32>
    %29 = arith.truncf %28 : vector<32x128xf32> to vector<32x128xbf16>
    %30 = vector.extract_strided_slice %25 {offsets = [0, 128], sizes = [32, 256], strides = [1, 1]} : vector<32x384xf32> to vector<32x256xf32>
    %31 = arith.truncf %30 : vector<32x256xf32> to vector<32x256xbf16>
    %c0_23 = arith.constant 0 : index
    %c0_24 = arith.constant 0 : index
    %32 = vector.load %arg4[%c0_23, %c0_24] : memref<2x16xf32, #tpu.memory_space<vmem>>, vector<2x16xf32>
    %33 = vector.extract_strided_slice %32 {offsets = [0, 0], sizes = [1, 16], strides = [1, 1]} : vector<2x16xf32> to vector<1x16xf32>
    %34 = vector.extract_strided_slice %29 {offsets = [0, 0], sizes = [16, 32], strides = [1, 1]} : vector<32x128xbf16> to vector<16x32xbf16>
    %35 = vector.extract_strided_slice %31 {offsets = [0, 0], sizes = [16, 32], strides = [1, 1]} : vector<32x256xbf16> to vector<16x32xbf16>
    %36 = vector.extract_strided_slice %31 {offsets = [0, 128], sizes = [16, 32], strides = [1, 1]} : vector<32x256xbf16> to vector<16x32xbf16>
    %cst_25 = arith.constant dense<0.000000e+00> : vector<16x16xf32>
    %37 = tpu.matmul %34, %35, %cst_25 {dimension_numbers = #tpu.dot_dimension_numbers<[1], [1], [0], [0], [0, 0, 1, 0], [], []>} : vector<16x32xbf16>, vector<16x32xbf16>, vector<16x16xf32> -> vector<16x16xf32>
    %38 = vector.broadcast %33 : vector<1x16xf32> to vector<16x16xf32>
    %39 = arith.addf %37, %38 : vector<16x16xf32>
    %cst_26 = arith.constant dense<0xFF800000> : vector<16xf32>
    %40 = vector.multi_reduction <maximumf>, %39, %cst_26 [1] : vector<16x16xf32> to vector<16xf32>
    %41 = vector.shape_cast %40 : vector<16xf32> to vector<16x1xf32>
    %42 = vector.broadcast %41 : vector<16x1xf32> to vector<16x16xf32>
    %43 = arith.subf %39, %42 : vector<16x16xf32>
    %44 = math.exp %43 : vector<16x16xf32>
    %cst_27 = arith.constant dense<0.000000e+00> : vector<16xf32>
    %45 = vector.multi_reduction <add>, %44, %cst_27 [1] : vector<16x16xf32> to vector<16xf32>
    %46 = vector.shape_cast %45 : vector<16xf32> to vector<16x1xf32>
    %47 = tpu.reciprocal %46 {approx = true} : vector<16x1xf32> -> vector<16x1xf32>
    %48 = vector.broadcast %47 : vector<16x1xf32> to vector<16x16xf32>
    %49 = arith.mulf %44, %48 : vector<16x16xf32>
    %50 = arith.truncf %49 : vector<16x16xf32> to vector<16x16xbf16>
    %cst_28 = arith.constant dense<0.000000e+00> : vector<16x32xf32>
    %51 = tpu.matmul %50, %36, %cst_28 {dimension_numbers = #tpu.dot_dimension_numbers<[1], [0], [0], [1], [0, 0, 1, 1], [], []>} : vector<16x16xbf16>, vector<16x32xbf16>, vector<16x32xf32> -> vector<16x32xf32>
    %52 = arith.truncf %51 : vector<16x32xf32> to vector<16x32xbf16>
    %53 = vector.extract_strided_slice %29 {offsets = [0, 32], sizes = [16, 32], strides = [1, 1]} : vector<32x128xbf16> to vector<16x32xbf16>
    %54 = vector.extract_strided_slice %31 {offsets = [0, 32], sizes = [16, 32], strides = [1, 1]} : vector<32x256xbf16> to vector<16x32xbf16>
    %55 = vector.extract_strided_slice %31 {offsets = [0, 160], sizes = [16, 32], strides = [1, 1]} : vector<32x256xbf16> to vector<16x32xbf16>
    %cst_29 = arith.constant dense<0.000000e+00> : vector<16x16xf32>
    %56 = tpu.matmul %53, %54, %cst_29 {dimension_numbers = #tpu.dot_dimension_numbers<[1], [1], [0], [0], [0, 0, 1, 0], [], []>} : vector<16x32xbf16>, vector<16x32xbf16>, vector<16x16xf32> -> vector<16x16xf32>
    %57 = vector.broadcast %33 : vector<1x16xf32> to vector<16x16xf32>
    %58 = arith.addf %56, %57 : vector<16x16xf32>
    %cst_30 = arith.constant dense<0xFF800000> : vector<16xf32>
    %59 = vector.multi_reduction <maximumf>, %58, %cst_30 [1] : vector<16x16xf32> to vector<16xf32>
    %60 = vector.shape_cast %59 : vector<16xf32> to vector<16x1xf32>
    %61 = vector.broadcast %60 : vector<16x1xf32> to vector<16x16xf32>
    %62 = arith.subf %58, %61 : vector<16x16xf32>
    %63 = math.exp %62 : vector<16x16xf32>
    %cst_31 = arith.constant dense<0.000000e+00> : vector<16xf32>
    %64 = vector.multi_reduction <add>, %63, %cst_31 [1] : vector<16x16xf32> to vector<16xf32>
    %65 = vector.shape_cast %64 : vector<16xf32> to vector<16x1xf32>
    %66 = tpu.reciprocal %65 {approx = true} : vector<16x1xf32> -> vector<16x1xf32>
    %67 = vector.broadcast %66 : vector<16x1xf32> to vector<16x16xf32>
    %68 = arith.mulf %63, %67 : vector<16x16xf32>
    %69 = arith.truncf %68 : vector<16x16xf32> to vector<16x16xbf16>
    %cst_32 = arith.constant dense<0.000000e+00> : vector<16x32xf32>
    %70 = tpu.matmul %69, %55, %cst_32 {dimension_numbers = #tpu.dot_dimension_numbers<[1], [0], [0], [1], [0, 0, 1, 1], [], []>} : vector<16x16xbf16>, vector<16x32xbf16>, vector<16x32xf32> -> vector<16x32xf32>
    %71 = arith.truncf %70 : vector<16x32xf32> to vector<16x32xbf16>
    %72 = vector.extract_strided_slice %29 {offsets = [0, 64], sizes = [16, 32], strides = [1, 1]} : vector<32x128xbf16> to vector<16x32xbf16>
    %73 = vector.extract_strided_slice %31 {offsets = [0, 64], sizes = [16, 32], strides = [1, 1]} : vector<32x256xbf16> to vector<16x32xbf16>
    %74 = vector.extract_strided_slice %31 {offsets = [0, 192], sizes = [16, 32], strides = [1, 1]} : vector<32x256xbf16> to vector<16x32xbf16>
    %cst_33 = arith.constant dense<0.000000e+00> : vector<16x16xf32>
    %75 = tpu.matmul %72, %73, %cst_33 {dimension_numbers = #tpu.dot_dimension_numbers<[1], [1], [0], [0], [0, 0, 1, 0], [], []>} : vector<16x32xbf16>, vector<16x32xbf16>, vector<16x16xf32> -> vector<16x16xf32>
    %76 = vector.broadcast %33 : vector<1x16xf32> to vector<16x16xf32>
    %77 = arith.addf %75, %76 : vector<16x16xf32>
    %cst_34 = arith.constant dense<0xFF800000> : vector<16xf32>
    %78 = vector.multi_reduction <maximumf>, %77, %cst_34 [1] : vector<16x16xf32> to vector<16xf32>
    %79 = vector.shape_cast %78 : vector<16xf32> to vector<16x1xf32>
    %80 = vector.broadcast %79 : vector<16x1xf32> to vector<16x16xf32>
    %81 = arith.subf %77, %80 : vector<16x16xf32>
    %82 = math.exp %81 : vector<16x16xf32>
    %cst_35 = arith.constant dense<0.000000e+00> : vector<16xf32>
    %83 = vector.multi_reduction <add>, %82, %cst_35 [1] : vector<16x16xf32> to vector<16xf32>
    %84 = vector.shape_cast %83 : vector<16xf32> to vector<16x1xf32>
    %85 = tpu.reciprocal %84 {approx = true} : vector<16x1xf32> -> vector<16x1xf32>
    %86 = vector.broadcast %85 : vector<16x1xf32> to vector<16x16xf32>
    %87 = arith.mulf %82, %86 : vector<16x16xf32>
    %88 = arith.truncf %87 : vector<16x16xf32> to vector<16x16xbf16>
    %cst_36 = arith.constant dense<0.000000e+00> : vector<16x32xf32>
    %89 = tpu.matmul %88, %74, %cst_36 {dimension_numbers = #tpu.dot_dimension_numbers<[1], [0], [0], [1], [0, 0, 1, 1], [], []>} : vector<16x16xbf16>, vector<16x32xbf16>, vector<16x32xf32> -> vector<16x32xf32>
    %90 = arith.truncf %89 : vector<16x32xf32> to vector<16x32xbf16>
    %91 = vector.extract_strided_slice %29 {offsets = [0, 96], sizes = [16, 32], strides = [1, 1]} : vector<32x128xbf16> to vector<16x32xbf16>
    %92 = vector.extract_strided_slice %31 {offsets = [0, 96], sizes = [16, 32], strides = [1, 1]} : vector<32x256xbf16> to vector<16x32xbf16>
    %93 = vector.extract_strided_slice %31 {offsets = [0, 224], sizes = [16, 32], strides = [1, 1]} : vector<32x256xbf16> to vector<16x32xbf16>
    %cst_37 = arith.constant dense<0.000000e+00> : vector<16x16xf32>
    %94 = tpu.matmul %91, %92, %cst_37 {dimension_numbers = #tpu.dot_dimension_numbers<[1], [1], [0], [0], [0, 0, 1, 0], [], []>} : vector<16x32xbf16>, vector<16x32xbf16>, vector<16x16xf32> -> vector<16x16xf32>
    %95 = vector.broadcast %33 : vector<1x16xf32> to vector<16x16xf32>
    %96 = arith.addf %94, %95 : vector<16x16xf32>
    %cst_38 = arith.constant dense<0xFF800000> : vector<16xf32>
    %97 = vector.multi_reduction <maximumf>, %96, %cst_38 [1] : vector<16x16xf32> to vector<16xf32>
    %98 = vector.shape_cast %97 : vector<16xf32> to vector<16x1xf32>
    %99 = vector.broadcast %98 : vector<16x1xf32> to vector<16x16xf32>
    %100 = arith.subf %96, %99 : vector<16x16xf32>
    %101 = math.exp %100 : vector<16x16xf32>
    %cst_39 = arith.constant dense<0.000000e+00> : vector<16xf32>
    %102 = vector.multi_reduction <add>, %101, %cst_39 [1] : vector<16x16xf32> to vector<16xf32>
    %103 = vector.shape_cast %102 : vector<16xf32> to vector<16x1xf32>
    %104 = tpu.reciprocal %103 {approx = true} : vector<16x1xf32> -> vector<16x1xf32>
    %105 = vector.broadcast %104 : vector<16x1xf32> to vector<16x16xf32>
    %106 = arith.mulf %101, %105 : vector<16x16xf32>
    %107 = arith.truncf %106 : vector<16x16xf32> to vector<16x16xbf16>
    %cst_40 = arith.constant dense<0.000000e+00> : vector<16x32xf32>
    %108 = tpu.matmul %107, %93, %cst_40 {dimension_numbers = #tpu.dot_dimension_numbers<[1], [0], [0], [1], [0, 0, 1, 1], [], []>} : vector<16x16xbf16>, vector<16x32xbf16>, vector<16x32xf32> -> vector<16x32xf32>
    %109 = arith.truncf %108 : vector<16x32xf32> to vector<16x32xbf16>
    %110 = tpu.concatenate %52, %71, %90, %109 in 1 : vector<16x32xbf16>, vector<16x32xbf16>, vector<16x32xbf16>, vector<16x32xbf16> -> vector<16x128xbf16>
    %111 = vector.extract_strided_slice %32 {offsets = [1, 0], sizes = [1, 16], strides = [1, 1]} : vector<2x16xf32> to vector<1x16xf32>
    %112 = vector.extract_strided_slice %29 {offsets = [16, 0], sizes = [16, 32], strides = [1, 1]} : vector<32x128xbf16> to vector<16x32xbf16>
    %113 = vector.extract_strided_slice %31 {offsets = [16, 0], sizes = [16, 32], strides = [1, 1]} : vector<32x256xbf16> to vector<16x32xbf16>
    %114 = vector.extract_strided_slice %31 {offsets = [16, 128], sizes = [16, 32], strides = [1, 1]} : vector<32x256xbf16> to vector<16x32xbf16>
    %cst_41 = arith.constant dense<0.000000e+00> : vector<16x16xf32>
    %115 = tpu.matmul %112, %113, %cst_41 {dimension_numbers = #tpu.dot_dimension_numbers<[1], [1], [0], [0], [0, 0, 1, 0], [], []>} : vector<16x32xbf16>, vector<16x32xbf16>, vector<16x16xf32> -> vector<16x16xf32>
    %116 = vector.broadcast %111 : vector<1x16xf32> to vector<16x16xf32>
    %117 = arith.addf %115, %116 : vector<16x16xf32>
    %cst_42 = arith.constant dense<0xFF800000> : vector<16xf32>
    %118 = vector.multi_reduction <maximumf>, %117, %cst_42 [1] : vector<16x16xf32> to vector<16xf32>
    %119 = vector.shape_cast %118 : vector<16xf32> to vector<16x1xf32>
    %120 = vector.broadcast %119 : vector<16x1xf32> to vector<16x16xf32>
    %121 = arith.subf %117, %120 : vector<16x16xf32>
    %122 = math.exp %121 : vector<16x16xf32>
    %cst_43 = arith.constant dense<0.000000e+00> : vector<16xf32>
    %123 = vector.multi_reduction <add>, %122, %cst_43 [1] : vector<16x16xf32> to vector<16xf32>
    %124 = vector.shape_cast %123 : vector<16xf32> to vector<16x1xf32>
    %125 = tpu.reciprocal %124 {approx = true} : vector<16x1xf32> -> vector<16x1xf32>
    %126 = vector.broadcast %125 : vector<16x1xf32> to vector<16x16xf32>
    %127 = arith.mulf %122, %126 : vector<16x16xf32>
    %128 = arith.truncf %127 : vector<16x16xf32> to vector<16x16xbf16>
    %cst_44 = arith.constant dense<0.000000e+00> : vector<16x32xf32>
    %129 = tpu.matmul %128, %114, %cst_44 {dimension_numbers = #tpu.dot_dimension_numbers<[1], [0], [0], [1], [0, 0, 1, 1], [], []>} : vector<16x16xbf16>, vector<16x32xbf16>, vector<16x32xf32> -> vector<16x32xf32>
    %130 = arith.truncf %129 : vector<16x32xf32> to vector<16x32xbf16>
    %131 = vector.extract_strided_slice %29 {offsets = [16, 32], sizes = [16, 32], strides = [1, 1]} : vector<32x128xbf16> to vector<16x32xbf16>
    %132 = vector.extract_strided_slice %31 {offsets = [16, 32], sizes = [16, 32], strides = [1, 1]} : vector<32x256xbf16> to vector<16x32xbf16>
    %133 = vector.extract_strided_slice %31 {offsets = [16, 160], sizes = [16, 32], strides = [1, 1]} : vector<32x256xbf16> to vector<16x32xbf16>
    %cst_45 = arith.constant dense<0.000000e+00> : vector<16x16xf32>
    %134 = tpu.matmul %131, %132, %cst_45 {dimension_numbers = #tpu.dot_dimension_numbers<[1], [1], [0], [0], [0, 0, 1, 0], [], []>} : vector<16x32xbf16>, vector<16x32xbf16>, vector<16x16xf32> -> vector<16x16xf32>
    %135 = vector.broadcast %111 : vector<1x16xf32> to vector<16x16xf32>
    %136 = arith.addf %134, %135 : vector<16x16xf32>
    %cst_46 = arith.constant dense<0xFF800000> : vector<16xf32>
    %137 = vector.multi_reduction <maximumf>, %136, %cst_46 [1] : vector<16x16xf32> to vector<16xf32>
    %138 = vector.shape_cast %137 : vector<16xf32> to vector<16x1xf32>
    %139 = vector.broadcast %138 : vector<16x1xf32> to vector<16x16xf32>
    %140 = arith.subf %136, %139 : vector<16x16xf32>
    %141 = math.exp %140 : vector<16x16xf32>
    %cst_47 = arith.constant dense<0.000000e+00> : vector<16xf32>
    %142 = vector.multi_reduction <add>, %141, %cst_47 [1] : vector<16x16xf32> to vector<16xf32>
    %143 = vector.shape_cast %142 : vector<16xf32> to vector<16x1xf32>
    %144 = tpu.reciprocal %143 {approx = true} : vector<16x1xf32> -> vector<16x1xf32>
    %145 = vector.broadcast %144 : vector<16x1xf32> to vector<16x16xf32>
    %146 = arith.mulf %141, %145 : vector<16x16xf32>
    %147 = arith.truncf %146 : vector<16x16xf32> to vector<16x16xbf16>
    %cst_48 = arith.constant dense<0.000000e+00> : vector<16x32xf32>
    %148 = tpu.matmul %147, %133, %cst_48 {dimension_numbers = #tpu.dot_dimension_numbers<[1], [0], [0], [1], [0, 0, 1, 1], [], []>} : vector<16x16xbf16>, vector<16x32xbf16>, vector<16x32xf32> -> vector<16x32xf32>
    %149 = arith.truncf %148 : vector<16x32xf32> to vector<16x32xbf16>
    %150 = vector.extract_strided_slice %29 {offsets = [16, 64], sizes = [16, 32], strides = [1, 1]} : vector<32x128xbf16> to vector<16x32xbf16>
    %151 = vector.extract_strided_slice %31 {offsets = [16, 64], sizes = [16, 32], strides = [1, 1]} : vector<32x256xbf16> to vector<16x32xbf16>
    %152 = vector.extract_strided_slice %31 {offsets = [16, 192], sizes = [16, 32], strides = [1, 1]} : vector<32x256xbf16> to vector<16x32xbf16>
    %cst_49 = arith.constant dense<0.000000e+00> : vector<16x16xf32>
    %153 = tpu.matmul %150, %151, %cst_49 {dimension_numbers = #tpu.dot_dimension_numbers<[1], [1], [0], [0], [0, 0, 1, 0], [], []>} : vector<16x32xbf16>, vector<16x32xbf16>, vector<16x16xf32> -> vector<16x16xf32>
    %154 = vector.broadcast %111 : vector<1x16xf32> to vector<16x16xf32>
    %155 = arith.addf %153, %154 : vector<16x16xf32>
    %cst_50 = arith.constant dense<0xFF800000> : vector<16xf32>
    %156 = vector.multi_reduction <maximumf>, %155, %cst_50 [1] : vector<16x16xf32> to vector<16xf32>
    %157 = vector.shape_cast %156 : vector<16xf32> to vector<16x1xf32>
    %158 = vector.broadcast %157 : vector<16x1xf32> to vector<16x16xf32>
    %159 = arith.subf %155, %158 : vector<16x16xf32>
    %160 = math.exp %159 : vector<16x16xf32>
    %cst_51 = arith.constant dense<0.000000e+00> : vector<16xf32>
    %161 = vector.multi_reduction <add>, %160, %cst_51 [1] : vector<16x16xf32> to vector<16xf32>
    %162 = vector.shape_cast %161 : vector<16xf32> to vector<16x1xf32>
    %163 = tpu.reciprocal %162 {approx = true} : vector<16x1xf32> -> vector<16x1xf32>
    %164 = vector.broadcast %163 : vector<16x1xf32> to vector<16x16xf32>
    %165 = arith.mulf %160, %164 : vector<16x16xf32>
    %166 = arith.truncf %165 : vector<16x16xf32> to vector<16x16xbf16>
    %cst_52 = arith.constant dense<0.000000e+00> : vector<16x32xf32>
    %167 = tpu.matmul %166, %152, %cst_52 {dimension_numbers = #tpu.dot_dimension_numbers<[1], [0], [0], [1], [0, 0, 1, 1], [], []>} : vector<16x16xbf16>, vector<16x32xbf16>, vector<16x32xf32> -> vector<16x32xf32>
    %168 = arith.truncf %167 : vector<16x32xf32> to vector<16x32xbf16>
    %169 = vector.extract_strided_slice %29 {offsets = [16, 96], sizes = [16, 32], strides = [1, 1]} : vector<32x128xbf16> to vector<16x32xbf16>
    %170 = vector.extract_strided_slice %31 {offsets = [16, 96], sizes = [16, 32], strides = [1, 1]} : vector<32x256xbf16> to vector<16x32xbf16>
    %171 = vector.extract_strided_slice %31 {offsets = [16, 224], sizes = [16, 32], strides = [1, 1]} : vector<32x256xbf16> to vector<16x32xbf16>
    %cst_53 = arith.constant dense<0.000000e+00> : vector<16x16xf32>
    %172 = tpu.matmul %169, %170, %cst_53 {dimension_numbers = #tpu.dot_dimension_numbers<[1], [1], [0], [0], [0, 0, 1, 0], [], []>} : vector<16x32xbf16>, vector<16x32xbf16>, vector<16x16xf32> -> vector<16x16xf32>
    %173 = vector.broadcast %111 : vector<1x16xf32> to vector<16x16xf32>
    %174 = arith.addf %172, %173 : vector<16x16xf32>
    %cst_54 = arith.constant dense<0xFF800000> : vector<16xf32>
    %175 = vector.multi_reduction <maximumf>, %174, %cst_54 [1] : vector<16x16xf32> to vector<16xf32>
    %176 = vector.shape_cast %175 : vector<16xf32> to vector<16x1xf32>
    %177 = vector.broadcast %176 : vector<16x1xf32> to vector<16x16xf32>
    %178 = arith.subf %174, %177 : vector<16x16xf32>
    %179 = math.exp %178 : vector<16x16xf32>
    %cst_55 = arith.constant dense<0.000000e+00> : vector<16xf32>
    %180 = vector.multi_reduction <add>, %179, %cst_55 [1] : vector<16x16xf32> to vector<16xf32>
    %181 = vector.shape_cast %180 : vector<16xf32> to vector<16x1xf32>
    %182 = tpu.reciprocal %181 {approx = true} : vector<16x1xf32> -> vector<16x1xf32>
    %183 = vector.broadcast %182 : vector<16x1xf32> to vector<16x16xf32>
    %184 = arith.mulf %179, %183 : vector<16x16xf32>
    %185 = arith.truncf %184 : vector<16x16xf32> to vector<16x16xbf16>
    %cst_56 = arith.constant dense<0.000000e+00> : vector<16x32xf32>
    %186 = tpu.matmul %185, %171, %cst_56 {dimension_numbers = #tpu.dot_dimension_numbers<[1], [0], [0], [1], [0, 0, 1, 1], [], []>} : vector<16x16xbf16>, vector<16x32xbf16>, vector<16x32xf32> -> vector<16x32xf32>
    %187 = arith.truncf %186 : vector<16x32xf32> to vector<16x32xbf16>
    %188 = tpu.concatenate %130, %149, %168, %187 in 1 : vector<16x32xbf16>, vector<16x32xbf16>, vector<16x32xbf16>, vector<16x32xbf16> -> vector<16x128xbf16>
    %189 = tpu.concatenate %110, %188 in 0 : vector<16x128xbf16>, vector<16x128xbf16> -> vector<32x128xbf16>
    %c0_57 = arith.constant 0 : index
    %c0_58 = arith.constant 0 : index
    %c0_59 = arith.constant 0 : index
    %190 = vector.load %arg6[%c0_57, %c0_58, %c0_59] : memref<1x128x128xbf16, #tpu.memory_space<vmem>>, vector<1x128x128xbf16>
    %191 = vector.shape_cast %190 : vector<1x128x128xbf16> to vector<128x128xbf16>
    %cst_60 = arith.constant dense<0.000000e+00> : vector<32x128xf32>
    %192 = tpu.matmul %189, %191, %cst_60 {dimension_numbers = #tpu.dot_dimension_numbers<[1], [0], [0], [1], [0, 0, 1, 1], [], []>} : vector<32x128xbf16>, vector<128x128xbf16>, vector<32x128xf32> -> vector<32x128xf32>
    %193 = vector.broadcast %10 : vector<1x128xf32> to vector<32x128xf32>
    %194 = arith.addf %192, %193 : vector<32x128xf32>
    %195 = arith.addf %3, %194 : vector<32x128xf32>
    %cst_61 = arith.constant dense<0.000000e+00> : vector<32xf32>
    %196 = vector.multi_reduction <add>, %195, %cst_61 [1] : vector<32x128xf32> to vector<32xf32>
    %197 = vector.shape_cast %196 : vector<32xf32> to vector<32x1xf32>
    %cst_62 = arith.constant 1.280000e+02 : f32
    %198 = vector.broadcast %cst_62 : f32 to vector<32x1xf32>
    %199 = arith.divf %197, %198 : vector<32x1xf32>
    %200 = vector.broadcast %199 : vector<32x1xf32> to vector<32x128xf32>
    %201 = arith.subf %195, %200 : vector<32x128xf32>
    %202 = vector.broadcast %199 : vector<32x1xf32> to vector<32x128xf32>
    %203 = arith.subf %195, %202 : vector<32x128xf32>
    %204 = arith.mulf %201, %203 : vector<32x128xf32>
    %cst_63 = arith.constant dense<0.000000e+00> : vector<32xf32>
    %205 = vector.multi_reduction <add>, %204, %cst_63 [1] : vector<32x128xf32> to vector<32xf32>
    %206 = vector.shape_cast %205 : vector<32xf32> to vector<32x1xf32>
    %cst_64 = arith.constant 1.280000e+02 : f32
    %207 = vector.broadcast %cst_64 : f32 to vector<32x1xf32>
    %208 = arith.divf %206, %207 : vector<32x1xf32>
    %209 = vector.broadcast %199 : vector<32x1xf32> to vector<32x128xf32>
    %210 = arith.subf %195, %209 : vector<32x128xf32>
    %cst_65 = arith.constant 9.99999974E-6 : f32
    %211 = vector.broadcast %cst_65 : f32 to vector<32x1xf32>
    %212 = arith.addf %208, %211 : vector<32x1xf32>
    %213 = math.rsqrt %212 : vector<32x1xf32>
    %214 = vector.broadcast %213 : vector<32x1xf32> to vector<32x128xf32>
    %215 = arith.mulf %210, %214 : vector<32x128xf32>
    %216 = vector.broadcast %14 : vector<1x128xf32> to vector<32x128xf32>
    %217 = arith.mulf %215, %216 : vector<32x128xf32>
    %218 = vector.broadcast %16 : vector<1x128xf32> to vector<32x128xf32>
    %219 = arith.addf %217, %218 : vector<32x128xf32>
    %220 = arith.truncf %219 : vector<32x128xf32> to vector<32x128xbf16>
    %c0_66 = arith.constant 0 : index
    %c0_67 = arith.constant 0 : index
    %c0_68 = arith.constant 0 : index
    %221 = vector.load %arg7[%c0_66, %c0_67, %c0_68] : memref<1x128x256xbf16, #tpu.memory_space<vmem>>, vector<1x128x256xbf16>
    %222 = vector.shape_cast %221 : vector<1x128x256xbf16> to vector<128x256xbf16>
    %cst_69 = arith.constant dense<0.000000e+00> : vector<32x256xf32>
    %223 = tpu.matmul %220, %222, %cst_69 {dimension_numbers = #tpu.dot_dimension_numbers<[1], [0], [0], [1], [0, 0, 1, 1], [], []>} : vector<32x128xbf16>, vector<128x256xbf16>, vector<32x256xf32> -> vector<32x256xf32>
    %224 = vector.broadcast %8 : vector<1x256xf32> to vector<32x256xf32>
    %225 = arith.addf %223, %224 : vector<32x256xf32>
    %cst_70 = arith.constant 0.000000e+00 : f32
    %226 = vector.broadcast %cst_70 : f32 to vector<32x256xf32>
    %227 = arith.maximumf %225, %226 : vector<32x256xf32>
    %228 = arith.truncf %227 : vector<32x256xf32> to vector<32x256xbf16>
    %c0_71 = arith.constant 0 : index
    %c0_72 = arith.constant 0 : index
    %c0_73 = arith.constant 0 : index
    %229 = vector.load %arg8[%c0_71, %c0_72, %c0_73] : memref<1x256x128xbf16, #tpu.memory_space<vmem>>, vector<1x256x128xbf16>
    %230 = vector.shape_cast %229 : vector<1x256x128xbf16> to vector<256x128xbf16>
    %cst_74 = arith.constant dense<0.000000e+00> : vector<32x128xf32>
    %231 = tpu.matmul %228, %230, %cst_74 {dimension_numbers = #tpu.dot_dimension_numbers<[1], [0], [0], [1], [0, 0, 1, 1], [], []>} : vector<32x256xbf16>, vector<256x128xbf16>, vector<32x128xf32> -> vector<32x128xf32>
    %232 = vector.broadcast %12 : vector<1x128xf32> to vector<32x128xf32>
    %233 = arith.addf %231, %232 : vector<32x128xf32>
    %234 = arith.addf %219, %233 : vector<32x128xf32>
    %cst_75 = arith.constant dense<0.000000e+00> : vector<32xf32>
    %235 = vector.multi_reduction <add>, %234, %cst_75 [1] : vector<32x128xf32> to vector<32xf32>
    %236 = vector.shape_cast %235 : vector<32xf32> to vector<32x1xf32>
    %cst_76 = arith.constant 1.280000e+02 : f32
    %237 = vector.broadcast %cst_76 : f32 to vector<32x1xf32>
    %238 = arith.divf %236, %237 : vector<32x1xf32>
    %239 = vector.broadcast %238 : vector<32x1xf32> to vector<32x128xf32>
    %240 = arith.subf %234, %239 : vector<32x128xf32>
    %241 = vector.broadcast %238 : vector<32x1xf32> to vector<32x128xf32>
    %242 = arith.subf %234, %241 : vector<32x128xf32>
    %243 = arith.mulf %240, %242 : vector<32x128xf32>
    %cst_77 = arith.constant dense<0.000000e+00> : vector<32xf32>
    %244 = vector.multi_reduction <add>, %243, %cst_77 [1] : vector<32x128xf32> to vector<32xf32>
    %245 = vector.shape_cast %244 : vector<32xf32> to vector<32x1xf32>
    %cst_78 = arith.constant 1.280000e+02 : f32
    %246 = vector.broadcast %cst_78 : f32 to vector<32x1xf32>
    %247 = arith.divf %245, %246 : vector<32x1xf32>
    %248 = vector.broadcast %238 : vector<32x1xf32> to vector<32x128xf32>
    %249 = arith.subf %234, %248 : vector<32x128xf32>
    %cst_79 = arith.constant 9.99999974E-6 : f32
    %250 = vector.broadcast %cst_79 : f32 to vector<32x1xf32>
    %251 = arith.addf %247, %250 : vector<32x1xf32>
    %252 = math.rsqrt %251 : vector<32x1xf32>
    %253 = vector.broadcast %252 : vector<32x1xf32> to vector<32x128xf32>
    %254 = arith.mulf %249, %253 : vector<32x128xf32>
    %255 = vector.broadcast %18 : vector<1x128xf32> to vector<32x128xf32>
    %256 = arith.mulf %254, %255 : vector<32x128xf32>
    %257 = vector.broadcast %20 : vector<1x128xf32> to vector<32x128xf32>
    %258 = arith.addf %256, %257 : vector<32x128xf32>
    %c0_80 = arith.constant 0 : index
    %c0_81 = arith.constant 0 : index
    %259 = vector.load %arg11[%c0_80, %c0_81] : memref<32x128xf32, #tpu.memory_space<vmem>>, vector<32x128xf32>
    tpu.vector_store %arg11[%c0_80, %c0_81], %258 {strides = array<i32>} : memref<32x128xf32, #tpu.memory_space<vmem>>, vector<32x128xf32>,
    %c1_i32 = arith.constant 1 : i32
    %260 = arith.cmpi eq, %arg1, %c1_i32 : i32
    %261 = arith.extui %260 : i1 to i32
    %c0_i32_82 = arith.constant 0 : i32
    %262 = arith.cmpi ne, %261, %c0_i32_82 : i32
    scf.if %262 {
      %263 = vector.shape_cast %258 : vector<32x128xf32> to vector<2x16x128xf32>
      %c0_83 = arith.constant 0 : index
      %c0_84 = arith.constant 0 : index
      %c0_85 = arith.constant 0 : index
      %264 = vector.load %arg10[%c0_83, %c0_84, %c0_85] : memref<2x16x128xf32, #tpu.memory_space<vmem>>, vector<2x16x128xf32>
      tpu.vector_store %arg10[%c0_83, %c0_84, %c0_85], %263 {strides = array<i32>} : memref<2x16x128xf32, #tpu.memory_space<vmem>>, vector<2x16x128xf32>,
    } else {
    }
    return
  }
  func.func @transform_0(%arg0: i32, %arg1: i32) -> (i32, i32, i32) {
    %c0_i32 = arith.constant 0 : i32
    %c0_i32_0 = arith.constant 0 : i32
    %c0_i32_1 = arith.constant 0 : i32
    return %arg0, %c0_i32, %c0_i32_0 : i32, i32, i32
  }
  func.func @transform_1(%arg0: i32, %arg1: i32) -> (i32, i32) {
    %c0_i32 = arith.constant 0 : i32
    %c0_i32_0 = arith.constant 0 : i32
    %c0_i32_1 = arith.constant 0 : i32
    return %c0_i32, %c0_i32_0 : i32, i32
  }
  func.func @transform_2(%arg0: i32, %arg1: i32) -> (i32, i32) {
    %c0_i32 = arith.constant 0 : i32
    %c0_i32_0 = arith.constant 0 : i32
    return %arg0, %c0_i32 : i32, i32
  }
  func.func @transform_3(%arg0: i32, %arg1: i32) -> (i32, i32, i32) {
    %c0_i32 = arith.constant 0 : i32
    %c0_i32_0 = arith.constant 0 : i32
    %c0_i32_1 = arith.constant 0 : i32
    return %arg1, %c0_i32, %c0_i32_0 : i32, i32, i32
  }
  func.func @transform_4(%arg0: i32, %arg1: i32) -> (i32, i32, i32) {
    %c0_i32 = arith.constant 0 : i32
    %c0_i32_0 = arith.constant 0 : i32
    %c0_i32_1 = arith.constant 0 : i32
    return %arg1, %c0_i32, %c0_i32_0 : i32, i32, i32
  }
  func.func @transform_5(%arg0: i32, %arg1: i32) -> (i32, i32, i32) {
    %c0_i32 = arith.constant 0 : i32
    %c0_i32_0 = arith.constant 0 : i32
    %c0_i32_1 = arith.constant 0 : i32
    return %arg1, %c0_i32, %c0_i32_0 : i32, i32, i32
  }
  func.func @transform_6(%arg0: i32, %arg1: i32) -> (i32, i32, i32) {
    %c0_i32 = arith.constant 0 : i32
    %c0_i32_0 = arith.constant 0 : i32
    %c0_i32_1 = arith.constant 0 : i32
    return %arg1, %c0_i32, %c0_i32_0 : i32, i32, i32
  }
  func.func @transform_7(%arg0: i32, %arg1: i32) -> (i32, i32, i32) {
    %c0_i32 = arith.constant 0 : i32
    %c0_i32_0 = arith.constant 0 : i32
    %c0_i32_1 = arith.constant 0 : i32
    return %arg1, %c0_i32, %c0_i32_0 : i32, i32, i32
  }
  func.func @transform_8(%arg0: i32, %arg1: i32) -> (i32, i32, i32) {
    %c0_i32 = arith.constant 0 : i32
    %c0_i32_0 = arith.constant 0 : i32
    %c0_i32_1 = arith.constant 0 : i32
    return %arg0, %c0_i32, %c0_i32_0 : i32, i32, i32
  }
}

</mosaic_0001>

<bundles_post_ra>
// kernel: tpu_custom_call.1
= control target key start
LH: loop header
LB: loop body
LE: loop exit
PB: predicated region body
PF: predicated region fallthrough
CT: control target
= control target key end

     0   :  { %s4405_s0 = inlined_call_operand.hbm [shape: f32[2,16,128], index: 0, kind: input, shape index: {}]   ;;  %s4406_s1 = inlined_call_operand.hbm [shape: f32[16,128], index: 1, kind: input, shape index: {}]   ;;  %s4407_s2 = inlined_call_operand.vmem [shape: f32[2,16], index: 2, kind: input, shape index: {}]   ;;  %s4408_s3 = inlined_call_operand.hbm [shape: bf16[2,128,384], index: 3, kind: input, shape index: {}]   ;;  %s4409_s4 = inlined_call_operand.hbm [shape: bf16[2,128,128], index: 4, kind: input, shape index: {}]   ;;  %s4410_s5 = inlined_call_operand.hbm [shape: bf16[2,128,256], index: 5, kind: input, shape index: {}]   ;;  %s4411_s6 = inlined_call_operand.hbm [shape: bf16[2,256,128], index: 6, kind: input, shape index: {}]   ;;  %s4412_s7 = inlined_call_operand.hbm [shape: f32[2,8,384], index: 7, kind: input, shape index: {}]   ;;  %s4413_s8 = inlined_call_operand.hbm [shape: f32[2,16,128], index: 8, kind: output, shape index: {}]  }
   0x1   :  { %4432 = sst [smem:[#allocation21_spill]] %s4405_s0 }
   0x2   :  { %4433 = sst [smem:[#allocation22_spill]] %s4407_s2 }
   0x3   :  { %4434 = sst [smem:[#allocation23_spill]] %s4408_s3 }
   0x4   :  { %4435 = sst [smem:[#allocation24_spill]] %s4409_s4 }
   0x5   :  { %4436 = sst [smem:[#allocation25_spill]] %s4410_s5 }
   0x6   :  { %4437 = sst [smem:[#allocation26_spill]] %s4411_s6 }
   0x7   :  { %4438 = sst [smem:[#allocation27_spill]] %s4413_s8 }
   0x8   :  { %13 = vsyncpa [#allocation4], 0 }
   0x9   :  { %14 = vsyncpa [#allocation7], 0 }
   0xa   :  { %15 = vsyncpa [#allocation5], 0  ;;  %s3625_s27 = smov 0   ;;  %s3627_s28 = smov 0  }
   0xb   :  { %s3629_s29 = smov 0   ;;  %s3631_s30 = smov 0  }
   0xc   :  { %s3633_s9 = smov 0   ;;  %s3635_s10 = smov 0  }
   0xd LB: > { %4439 = sst [smem:[#allocation18_spill]] %s3544_s29  ;;  %s3654_s11 = sadd.s32 4294967295, %s3556_s10   ;;  %s3556_s10 = sphi %s3635_s10, %s21_s10   ;;  %s3552_s9 = sphi %s3633_s9, %s4477_s9   ;;  %s3548_s30 = sphi %s3631_s30, %s4476_s30   ;;  %s3544_s29 = sphi %s3629_s29, %s4472_s29   ;;  %s3540_s28 = sphi %s3627_s28, %s4475_s28   ;;  %s3536_s27 = sphi %s3625_s27, %s4474_s27  }
   0xe   : > { %p120_p0 = scmp.ne.s32.totalorder %s3544_s29, %s3540_s28  ;;  %p121_p1 = scmp.eq.s32.totalorder %s3556_s10, 0 }
   0xf   : > { %p126_p2 = scmp.ne.s32.totalorder %s3540_s28, %s3536_s27  ;;  %p4414_p3 = scmp.eq.s32.totalorder %s3654_s11, 0 }
  0x10   : > { %p122_p4 = por %p121_p1, %p120_p0  ;;  %p2647_p5 = scmp.ge.s32.totalorder %s3556_s10, 1 }
  0x11   : > { %p3665_p6 = por %p4414_p3, %p126_p2  ;;  %p267_p7 = scmp.lt.s32.totalorder %s3556_s10, 3 }
  0x12   : > { %s3558_s15 = smov [#allocation3]   ;;  %p3028_p10 = scmp.lt.s32.totalorder %s3556_s10, 2 }
  0x13   : > { %s4440_s13 = scalar_select %p3665_p6, 1, 0 }
  0x14   : > { %p3670_p8 = pnand %p2647_p5, %p267_p7  ;;  %s283_s16 = sshll.u32 %s3558_s15, 4  ;;  %s284_s16 = int_to_ptr.vmem [resolvable:$true] %s283_s16 }
  0x15   : > { %p3683_p12 = pnand %p3028_p10, %p122_p4  ;;  %s30_s19 = sadd.s32 1, %s3552_s9 }
  0x16   : > { %s4441_s14 = scalar_select %p3670_p8, 1, 0 }
  0x17   : > { %p3003_p9 = pneg %p3670_p8  ;;  %s4444_s0 = sld [smem:[#allocation21_spill]] }
  0x18   : > { %s4443_s18 = scalar_select %p3683_p12, 1, 0 }
  0x19   : > { %p3679_p11 = pnand %p3003_p9, %p4414_p3 }
  0x1b   : > { %s4442_s17 = scalar_select %p3679_p11, 1, 0 }
  0x1c   : > { %p4423_p0 = pneg %p3679_p11 }
  0x1d   : > { %s3262_s22 = scalar_lea.hbm %s4444_s0, 512 }
  0x1e   : > { %p3263_p13 = scmp.ne.s32.totalorder %s4444_s0, %s3262_s22  ;;  %p3269_p4 = scmp.lt.u32.totalorder %s3262_s22, %s4444_s0 }
  0x20   : > { %p3265_p1 = pnand %p4423_p0, %p3263_p13 }
  0x22   : > { %p3266_p2 = pneg %p3265_p1 }
  0x24   : > { %p3271_p5 = pnand %p3269_p4, %p3266_p2 }
  0x26   : > { %3274 = shalt.err (!%p3271_p5)
}
  0x27   : > { %s3275_s27 = scalar_lea.vmem %s284_s16, 512  ;;  %p3283_p3 = scmp.lt.s32.totalorder %s284_s16, %s284_s16 }
  0x28   : > { %p3276_p7 = scmp.ne.s32.totalorder %s284_s16, %s3275_s27  ;;  %p3284_p6 = scmp.lt.s32.totalorder %s3275_s27, %s3275_s27 }
  0x2a   : > { %p3278_p9 = pnand %p3276_p7, %p4423_p0  ;;  %p3285_p8 = por %p3284_p6, %p3283_p3 }
  0x2c   : > { %p3279_p10 = pneg %p3278_p9 }
  0x2e   : > { %p3286_p12 = pnand %p3285_p8, %p3279_p10 }
  0x30   : > { %3289 = shalt.err (!%p3286_p12)
}
  0x31   : > { %s4419_s15 = smov 128   ;;  %s4421_s20 = smov 8  }
  0x32   : > { %3006 = dma.hbm_to_vmem [thread:$0]  (!%p3679_p11), %s4444_s0, 512, %s284_s16, [#allocation4], %s4419_s15, %s4419_s15, %s4421_s20  }
  0x33   : > { %p31_p3 = scmp.ge.s32.totalorder %s30_s19, 2  ;;  %s317_s23 = sand.u32 1, %s3556_s10  }
  0x34   : > { %s3715_s24 = sand.u32 1, %s3544_s29   ;;  %s2976_s27 = smul.u32 3072, %s3552_s9 }
  0x35   : > { %s4479_s19 = smov (%p31_p3, %s30_s19), 0  ;;  %s2975_s25 = smul.u32 192, %s3715_s24 }
  0x36   : > { %4445 = sst [smem:[#allocation19_spill]] %s4479_s19  ;;  %s110_s26 = ssub.s32 %s3552_s9, %s4479_s19 }
  0x37   : > { %p111_p6 = scmp.eq.s32.totalorder %s110_s26, 0  ;;  %s4446_s3 = sld [smem:[#allocation23_spill]] }
  0x38   : > { %s321_s16 = scalar_lea.vmem [#allocation8], %s2975_s25  ;;  %s4447_s22 = sadd.s32 1, %s3544_s29 }
  0x39   : > { %s328_s21 = sshll.u32 %s321_s16, 4  ;;  %s3736_s0 = scalar_lea.sflag [#allocation4], %s317_s23  ;;  %s3733_s21 = int_to_ptr.vmem [resolvable:$true] %s328_s21 }
  0x3a   : > { %s3731_s15 = scalar_select %p111_p6, %s3544_s29, %s4447_s22  }
  0x3b   : > { %p4449_p12 = scmp.ne.s32.totalorder %s4443_s18, 0 }
  0x3c   : > { %4448 = sst [smem:[#allocation20_spill]] %s3731_s15 }
  0x3d   : > { %s3726_s2 = scalar_lea.hbm %s4446_s3, %s2976_s27  ;;  %p3742_p13 = pneg %p4449_p12 }
  0x3e   : > { %s3290_s26 = scalar_lea.hbm %s3726_s2, 3072  ;;  %s3295_s27 = scalar_lea.hbm %s4446_s3, 6144 }
  0x3f   : > { %p3291_p8 = scmp.ne.s32.totalorder %s3726_s2, %s3290_s26  ;;  %p3296_p4 = scmp.lt.u32.totalorder %s3726_s2, %s4446_s3 }
  0x40   : > { %s4450_s8 = scalar_select %p3742_p13, 1, 0 }
  0x41   : > { %p3293_p1 = pnand %p3742_p13, %p3291_p8  ;;  %p3297_p5 = scmp.lt.u32.totalorder %s3295_s27, %s3290_s26 }
  0x42   : > { %p3299_p9 = scmp.lt.u32.totalorder %s3290_s26, %s3726_s2 }
  0x43   : > { %p3294_p2 = pneg %p3293_p1  ;;  %p3298_p7 = por %p3297_p5, %p3296_p4 }
  0x45   : > { %p3300_p10 = por %p3299_p9, %p3298_p7 }
  0x47   : > { %p3301_p3 = pnand %p3300_p10, %p3294_p2 }
  0x49   : > { %3304 = shalt.err (!%p3301_p3)
}
  0x4a   : > { %s3305_s23 = scalar_lea.vmem %s3733_s21, 3072  ;;  %s3561_s12 = smov [#allocation8]  }
  0x4b   : > { %p3306_p6 = scmp.ne.s32.totalorder %s3733_s21, %s3305_s23  ;;  %s3310_s25 = sshll.u32 %s3561_s12, 4  ;;  %s3311_s25 = int_to_ptr.vmem [resolvable:$false] %s3310_s25 }
  0x4c   : > { %s3312_s16 = scalar_lea.vmem %s3311_s25, 6144  ;;  %p3313_p0 = scmp.lt.s32.totalorder %s3733_s21, %s3311_s25 }
  0x4d   : > { %p3308_p8 = pnand %p3306_p6, %p3742_p13  ;;  %p3314_p11 = scmp.lt.s32.totalorder %s3312_s16, %s3305_s23 }
  0x4f   : > { %p3309_p1 = pneg %p3308_p8  ;;  %p3315_p4 = por %p3314_p11, %p3313_p0 }
  0x51   : > { %p3316_p5 = pnand %p3315_p4, %p3309_p1 }
  0x53   : > { %3319 = shalt.err (!%p3316_p5)
}
  0x54   : > { %s3562_s26 = smov 192   ;;  %s3563_s27 = smov 12  }
  0x55   : > { %3013 = dma.hbm_to_vmem [thread:$0]  (!%p4449_p12), %s3726_s2, 3072, %s3733_s21, %s3736_s0, %s3562_s26, %s3562_s26, %s3563_s27  }
  0x56   : > { %s2756_s22 = sshll.u32 %s3552_s9, 10  ;;  %s4451_s4 = sld [smem:[#allocation24_spill]] }
  0x57   : > { %s4452_s25 = sshll.u32 %s3715_s24, 6  ;;  %s2656_s19 = sshll.u32 %s3715_s24, 7 }
  0x58   : > { %s342_s16 = scalar_lea.vmem [#allocation9], %s4452_s25 }
  0x59   : > { %s349_s3 = sshll.u32 %s342_s16, 4  ;;  %s3774_s3 = int_to_ptr.vmem [resolvable:$true] %s349_s3 }
  0x5c   : > { %s3770_s23 = scalar_lea.hbm %s4451_s4, %s2756_s22  ;;  %s3325_s20 = scalar_lea.hbm %s4451_s4, 2048 }
  0x5d   : > { %s3320_s15 = scalar_lea.hbm %s3770_s23, 1024  ;;  %p3326_p7 = scmp.lt.u32.totalorder %s3770_s23, %s4451_s4 }
  0x5e   : > { %p3321_p11 = scmp.ne.s32.totalorder %s3770_s23, %s3320_s15  ;;  %p3327_p9 = scmp.lt.u32.totalorder %s3325_s20, %s3320_s15 }
  0x5f   : > { %p3329_p3 = scmp.lt.u32.totalorder %s3320_s15, %s3770_s23 }
  0x60   : > { %p3323_p0 = pnand %p3321_p11, %p3742_p13  ;;  %p3328_p10 = por %p3327_p9, %p3326_p7 }
  0x62   : > { %p3324_p2 = pneg %p3323_p0  ;;  %p3330_p6 = por %p3329_p3, %p3328_p10 }
  0x64   : > { %p3331_p8 = pnand %p3330_p6, %p3324_p2 }
  0x66   : > { %3334 = shalt.err (!%p3331_p8)
}
  0x67   : > { %s3335_s22 = scalar_lea.vmem %s3774_s3, 1024  ;;  %s3564_s12 = smov [#allocation9]  }
  0x68   : > { %p3336_p1 = scmp.ne.s32.totalorder %s3774_s3, %s3335_s22  ;;  %s3340_s25 = sshll.u32 %s3564_s12, 4  ;;  %s3341_s25 = int_to_ptr.vmem [resolvable:$false] %s3340_s25 }
  0x69   : > { %s3342_s16 = scalar_lea.vmem %s3341_s25, 2048  ;;  %p3343_p11 = scmp.lt.s32.totalorder %s3774_s3, %s3341_s25 }
  0x6a   : > { %p3338_p4 = pnand %p3336_p1, %p3742_p13  ;;  %p3344_p0 = scmp.lt.s32.totalorder %s3342_s16, %s3335_s22 }
  0x6c   : > { %p3339_p5 = pneg %p3338_p4  ;;  %p3345_p7 = por %p3344_p0, %p3343_p11 }
  0x6e   : > { %p3346_p9 = pnand %p3345_p7, %p3339_p5 }
  0x70   : > { %3349 = shalt.err (!%p3346_p9)
}
  0x71   : > { %s4427_s15 = smov 64   ;;  %s3566_s2 = smov 4  }
  0x72   : > { %3016 = dma.hbm_to_vmem [thread:$0]  (!%p4449_p12), %s3770_s23, 1024, %s3774_s3, %s3736_s0, %s4427_s15, %s4427_s15, %s3566_s2  }
  0x73   : > { %s2757_s21 = sshll.u32 %s3552_s9, 11  ;;  %s4453_s5 = sld [smem:[#allocation25_spill]] }
  0x74   : > { %s363_s22 = scalar_lea.vmem [#allocation10], %s2656_s19 }
  0x75   : > { %s370_s12 = sshll.u32 %s363_s22, 4  ;;  %s3812_s12 = int_to_ptr.vmem [resolvable:$true] %s370_s12 }
  0x79   : > { %s3808_s27 = scalar_lea.hbm %s4453_s5, %s2757_s21  ;;  %s3355_s16 = scalar_lea.hbm %s4453_s5, 4096 }
  0x7a   : > { %s3350_s25 = scalar_lea.hbm %s3808_s27, 2048  ;;  %p3356_p6 = scmp.lt.u32.totalorder %s3808_s27, %s4453_s5 }
  0x7b   : > { %p3351_p2 = scmp.ne.s32.totalorder %s3808_s27, %s3350_s25  ;;  %p3357_p8 = scmp.lt.u32.totalorder %s3355_s16, %s3350_s25 }
  0x7c   : > { %p3359_p4 = scmp.lt.u32.totalorder %s3350_s25, %s3808_s27 }
  0x7d   : > { %p3353_p10 = pnand %p3351_p2, %p3742_p13  ;;  %p3358_p1 = por %p3357_p8, %p3356_p6 }
  0x7f   : > { %p3354_p3 = pneg %p3353_p10  ;;  %p3360_p5 = por %p3359_p4, %p3358_p1 }
  0x81   : > { %p3361_p11 = pnand %p3360_p5, %p3354_p3 }
  0x83   : > { %3364 = shalt.err (!%p3361_p11)
}
  0x84   : > { %s3365_s22 = scalar_lea.vmem %s3812_s12, 2048  ;;  %s3567_s3 = smov [#allocation10]  }
  0x85   : > { %p3366_p0 = scmp.ne.s32.totalorder %s3812_s12, %s3365_s22  ;;  %s3370_s23 = sshll.u32 %s3567_s3, 4  ;;  %s3371_s23 = int_to_ptr.vmem [resolvable:$false] %s3370_s23 }
  0x86   : > { %s3372_s20 = scalar_lea.vmem %s3371_s23, 4096  ;;  %p3373_p2 = scmp.lt.s32.totalorder %s3812_s12, %s3371_s23 }
  0x87   : > { %p3368_p7 = pnand %p3366_p0, %p3742_p13  ;;  %p3374_p10 = scmp.lt.s32.totalorder %s3372_s20, %s3365_s22 }
  0x89   : > { %p3369_p9 = pneg %p3368_p7  ;;  %p3375_p6 = por %p3374_p10, %p3373_p2 }
  0x8b   : > { %p3376_p8 = pnand %p3375_p6, %p3369_p9 }
  0x8d   : > { %3379 = shalt.err (!%p3376_p8)
}
  0x8e   : > { %s4454_s25 = smov 8   ;;  %s4455_s16 = smov 128  }
  0x8f   : > { %3019 = dma.hbm_to_vmem [thread:$0]  (!%p4449_p12), %s3808_s27, 2048, %s3812_s12, %s3736_s0, %s4455_s16, %s4455_s16, %s4454_s25  }
  0x90   : > { %s4456_s6 = sld [smem:[#allocation26_spill]]  ;;  %s384_s23 = scalar_lea.vmem [#allocation11], %s2656_s19 }
  0x91   : > { %s391_s20 = sshll.u32 %s384_s23, 4  ;;  %s3848_s20 = int_to_ptr.vmem [resolvable:$true] %s391_s20 }
  0x96   : > { %s3844_s22 = scalar_lea.hbm %s4456_s6, %s2757_s21  ;;  %s3385_s26 = scalar_lea.hbm %s4456_s6, 4096 }
  0x97   : > { %s3380_s15 = scalar_lea.hbm %s3844_s22, 2048  ;;  %p3386_p5 = scmp.lt.u32.totalorder %s3844_s22, %s4456_s6 }
  0x98   : > { %p3381_p3 = scmp.ne.s32.totalorder %s3844_s22, %s3380_s15  ;;  %p3387_p11 = scmp.lt.u32.totalorder %s3385_s26, %s3380_s15 }
  0x99   : > { %p3389_p7 = scmp.lt.u32.totalorder %s3380_s15, %s3844_s22 }
  0x9a   : > { %p3383_p1 = pnand %p3381_p3, %p3742_p13  ;;  %p3388_p0 = por %p3387_p11, %p3386_p5 }
  0x9c   : > { %p3384_p4 = pneg %p3383_p1  ;;  %p3390_p9 = por %p3389_p7, %p3388_p0 }
  0x9e   : > { %p3391_p2 = pnand %p3390_p9, %p3384_p4 }
  0xa0   : > { %3394 = shalt.err (!%p3391_p2)
}
  0xa1   : > { %s3395_s19 = scalar_lea.vmem %s3848_s20, 2048  ;;  %s3568_s23 = smov [#allocation11]  }
  0xa2   : > { %p3396_p10 = scmp.ne.s32.totalorder %s3848_s20, %s3395_s19  ;;  %s3400_s27 = sshll.u32 %s3568_s23, 4  ;;  %s3401_s27 = int_to_ptr.vmem [resolvable:$false] %s3400_s27 }
  0xa3   : > { %s3402_s12 = scalar_lea.vmem %s3401_s27, 4096  ;;  %p3403_p3 = scmp.lt.s32.totalorder %s3848_s20, %s3401_s27 }
  0xa4   : > { %p3398_p6 = pnand %p3396_p10, %p3742_p13  ;;  %p3404_p1 = scmp.lt.s32.totalorder %s3402_s12, %s3395_s19 }
  0xa6   : > { %p3399_p8 = pneg %p3398_p6  ;;  %p3405_p5 = por %p3404_p1, %p3403_p3 }
  0xa8   : > { %p3406_p11 = pnand %p3405_p5, %p3399_p8 }
  0xaa   : > { %3409 = shalt.err (!%p3406_p11)
}
  0xab   : > { %s4457_s15 = smov 64   ;;  %s3569_s26 = smov [#allocation6]  }
  0xac   : > { %3022 = dma.hbm_to_vmem [thread:$0]  (!%p4449_p12), %s3844_s22, 2048, %s3848_s20, %s3736_s0, %s4457_s15, %s4457_s15, %s3566_s2  }
  0xad   : > { %s296_s21 = sshll.u32 %s3569_s26, 4  ;;  %s2977_s3 = smul.u32 24, %s3715_s24  ;;  %s297_s21 = int_to_ptr.vmem [resolvable:$true] %s296_s21 }
  0xae   : > { %s2978_s19 = smul.u32 384, %s3552_s9  ;;  %s3410_s12 = scalar_lea.hbm %s4406_s1, 256 }
  0xaf   : > { %p3411_p4 = scmp.ne.s32.totalorder %s4406_s1, %s3410_s12  ;;  %p4458_p0 = scmp.ne.s32.totalorder %s4442_s17, 0 }
  0xb0   : > { %p3417_p10 = scmp.lt.u32.totalorder %s3410_s12, %s4406_s1 }
  0xb1   : > { %p4459_p7 = pneg %p4458_p0 }
  0xb3   : > { %p3413_p9 = pnand %p3411_p4, %p4459_p7 }
  0xb5   : > { %p3414_p2 = pneg %p3413_p9 }
  0xb7   : > { %p3419_p6 = pnand %p3417_p10, %p3414_p2 }
  0xb9   : > { %3422 = shalt.err (!%p3419_p6)
}
  0xba   : > { %s3423_s24 = scalar_lea.vmem %s297_s21, 256  ;;  %p4460_p3 = pmov %p4459_p7 }
  0xbb   : > { %p3424_p8 = scmp.ne.s32.totalorder %s297_s21, %s3423_s24  ;;  %p3431_p11 = scmp.lt.s32.totalorder %s297_s21, %s297_s21 }
  0xbc   : > { %p3432_p12 = scmp.lt.s32.totalorder %s3423_s24, %s3423_s24 }
  0xbd   : > { %p3426_p1 = pnand %p3424_p8, %p4460_p3 }
  0xbe   : > { %p3433_p13 = por %p3432_p12, %p3431_p11 }
  0xbf   : > { %p3427_p5 = pneg %p3426_p1 }
  0xc1   : > { %p3434_p4 = pnand %p3433_p13, %p3427_p5 }
  0xc3   : > { %3437 = shalt.err (!%p3434_p4)
}
  0xc4   : > { %3009 = dma.hbm_to_vmem [thread:$0]  (!%p4458_p0), %s4406_s1, 256, %s297_s21, [#allocation7], %s4455_s16, %s4455_s16, %s4454_s25  }
  0xc5   : > { %s3903_s2 = scalar_lea.hbm %s4412_s7, %s2978_s19  ;;  %s405_s22 = scalar_lea.vmem [#allocation12], %s2977_s3 }
  0xc6   : > { %s413_s20 = sshll.u32 %s405_s22, 4  ;;  %s3438_s17 = scalar_lea.hbm %s3903_s2, 384  ;;  %s414_s20 = int_to_ptr.vmem [resolvable:$true] %s413_s20 }
  0xc7   : > { %p3439_p12 = scmp.ne.s32.totalorder %s3903_s2, %s3438_s17  ;;  %p4461_p13 = scmp.ne.s32.totalorder %s4450_s8, 0 }
  0xc8   : > { %s3443_s25 = scalar_lea.hbm %s4412_s7, 768  ;;  %p3444_p0 = scmp.lt.u32.totalorder %s3903_s2, %s4412_s7 }
  0xc9   : > { %p3441_p7 = pnand %p3439_p12, %p4461_p13  ;;  %p3445_p2 = scmp.lt.u32.totalorder %s3443_s25, %s3438_s17 }
  0xca   : > { %p3447_p6 = scmp.lt.u32.totalorder %s3438_s17, %s3903_s2 }
  0xcb   : > { %p3442_p9 = pneg %p3441_p7  ;;  %p3446_p10 = por %p3445_p2, %p3444_p0 }
  0xcd   : > { %p3448_p8 = por %p3447_p6, %p3446_p10 }
  0xcf   : > { %p3449_p3 = pnand %p3448_p8, %p3442_p9 }
  0xd1   : > { %3452 = shalt.err (!%p3449_p3)
}
  0xd2   : > { %s3453_s3 = scalar_lea.vmem %s414_s20, 384  ;;  %s3570_s19 = smov [#allocation12]  }
  0xd3   : > { %p3454_p1 = scmp.ne.s32.totalorder %s414_s20, %s3453_s3  ;;  %s3458_s23 = sshll.u32 %s3570_s19, 4  ;;  %s3459_s23 = int_to_ptr.vmem [resolvable:$false] %s3458_s23 }
  0xd4   : > { %s3460_s27 = scalar_lea.vmem %s3459_s23, 768  ;;  %p3461_p4 = scmp.lt.s32.totalorder %s414_s20, %s3459_s23 }
  0xd5   : > { %p3456_p5 = pnand %p3454_p1, %p4461_p13  ;;  %p3462_p12 = scmp.lt.s32.totalorder %s3460_s27, %s3453_s3 }
  0xd7   : > { %p3457_p11 = pneg %p3456_p5  ;;  %p3463_p7 = por %p3462_p12, %p3461_p4 }
  0xd9   : > { %p3464_p0 = pnand %p3463_p7, %p3457_p11 }
  0xdb   : > { %3467 = shalt.err (!%p3464_p0)
}
  0xdc   : > { %p4462_p2 = scmp.ne.s32.totalorder %s4443_s18, 0  ;;  %p4463_p9 = scmp.ne.s32.totalorder %s4441_s14, 0 }
  0xdd   : > { %p4464_p13 = scmp.eq.s32.totalorder (!%p4463_p9), %s3654_s11, 0 }
  0xde   : > { %3025 = dma.hbm_to_vmem [thread:$0]  (!%p4462_p2), %s3903_s2, 384, %s414_s20, %s3736_s0  }
  0xdf   : > { %422 = sbr.rel (%p4463_p9) target bundleno = 2946 (0xb82), region = 52 }
  0xe6   : > { %3519 = dma.done.wait (%p4464_p13), [#allocation4], 512   ;;  %p4465_p10 = pmov %p4464_p13 }
  0xe8   : > { %3521 = vsyncadd (%p4465_p10), [#allocation4], 4294966784  ;;  %p4466_p6 = pmov %p4465_p10 }
  0xea   : > { %3523 = dma.done.wait (%p4466_p6), [#allocation7], 256   ;;  %p4467_p8 = pmov %p4466_p6 }
  0xeb   : > { %s432_s18 = sand.u32 1, %s3654_s11   ;;  %s434_s0 = sand.u32 1, %s3540_s28  }
  0xec   : > { %3525 = vsyncadd (%p4467_p8), [#allocation7], 4294967040  ;;  %s2979_s8 = smul.u32 192, %s434_s0  ;;  %s433_s14 = scalar_lea.sflag [#allocation4], %s432_s18 }
  0xed   : > { %p4468_p3 = scmp.ne.s32.totalorder %s4440_s13, 0 }
  0xee   : > { %s3935_s12 = scalar_lea.vmem [#allocation8], %s2979_s8 }
  0xef   : > { %3527 = dma.done.wait (%p4468_p3), %s433_s14, 8576  }
  0xf0   : > { %3529 = vsyncadd (%p4468_p3), %s433_s14, 4294958720  ;;  %s2666_s24 = sshll.u32 %s434_s0, 6  ;;  %s2667_s4 = sshll.u32 %s434_s0, 7 }
  0xf1   : > { %s2980_s5 = smul.u32 24, %s434_s0  ;;  %s3941_s6 = scalar_lea.vmem [#allocation9], %s2666_s24 }
  0xf2   : > { %s3943_s29 = scalar_lea.vmem [#allocation10], %s2667_s4  ;;  %s3945_s2 = scalar_lea.vmem [#allocation11], %s2667_s4 }
  0xf3   : > { %s3947_s22 = scalar_lea.vmem [#allocation12], %s2980_s5  ;;  %p2669_p1 = scmp.ne.s32.totalorder %s3548_s30, 0 }
  0xf4   : > { %v535_v0 = vld [vmem:[#allocation3] sm:$0xff] (!%p2669_p1)  ;;  %v536_v2 = vld [vmem:[#allocation3 + $0x8] sm:$0xff] (!%p2669_p1)  ;;  %v537_v5 = vld [vmem:[#allocation3 + $0x10] sm:$0xff] (!%p2669_p1) }
  0xf5   : > { %534 = sbr.rel (%p2669_p1) target bundleno = 252 (0xfc), region = 84  ;;  %v539_v1 = vld [vmem:[#allocation6] sm:$0xff] (!%p2669_p1)  ;;  %v540_v4 = vld [vmem:[#allocation6 + $0x8] sm:$0xff] (!%p2669_p1)  ;;  %v538_v6 = vld [vmem:[#allocation3 + $0x18] sm:$0xff] (!%p2669_p1) }
  0xf6   : > { %v541_v3 = vadd.f32 (!%p2669_p1), %v539_v1, %v535_v0  ;;  %v542_v7 = vadd.f32 (!%p2669_p1), %v540_v4, %v536_v2  ;;  %v543_v8 = vadd.f32 (!%p2669_p1), %v539_v1, %v537_v5  ;;  %v544_v9 = vadd.f32 (!%p2669_p1), %v540_v4, %v538_v6 }
  0xf8   : > { %545 = vst [vmem:[#allocation2] sm:$0xff] (!%p2669_p1), %v541_v3  ;;  %546 = vst [vmem:[#allocation2 + $0x8] sm:$0xff] (!%p2669_p1), %v542_v7 }
  0xf9   : > { %547 = vst [vmem:[#allocation2 + $0x10] sm:$0xff] (!%p2669_p1), %v543_v8  ;;  %548 = vst [vmem:[#allocation2 + $0x18] sm:$0xff] (!%p2669_p1), %v544_v9 }
  0xfc PF: > { %v3098_v10 = vld [vmem:[%s3935_s12 + $0x4] ss:$12 sps:$4 sm:$0xff]   ;;  %v3100_v11 = vld [vmem:[%s3935_s12] ss:$12 sps:$4 sm:$0xff]   ;;  %v3571_v12 = vmov 0   ;;  %v3572_v33 = vmov 0.0   ;;  %v597_v42 = vlaneseq }
  0xfd   : > { %772 = vmatprep.mubr.bf16.mxu0 %v3571_v12  ;;  %740 = vmatprep.subr.bf16.mxu0 %v3098_v10  ;;  %v3101_v13 = vld [vmem:[%s3935_s12 + $0x1c] ss:$12 sps:$4 sm:$0xff]   ;;  %v3103_v14 = vld [vmem:[%s3935_s12 + $0x18] ss:$12 sps:$4 sm:$0xff]   ;;  %v3104_v15 = vld [vmem:[%s3935_s12 + $0x34] ss:$12 sps:$4 sm:$0xff]  }
  0xfe   : > { %741 = vmatpush1.bf16.msra.mxu0 %v3100_v11  ;;  %v3106_v16 = vld [vmem:[%s3935_s12 + $0x30] ss:$12 sps:$4 sm:$0xff]   ;;  %v3107_v17 = vld [vmem:[%s3935_s12 + $0x4c] ss:$12 sps:$4 sm:$0xff]   ;;  %v3109_v19 = vld [vmem:[%s3935_s12 + $0x48] ss:$12 sps:$4 sm:$0xff]  }
  0xff   : > { %742 = vmatprep.subr.bf16.mxu0 %v3101_v13  ;;  %v549_v18 = vld [vmem:[#allocation2] sm:$0xff]  ;;  %v550_v20 = vld [vmem:[#allocation2 + $0x8] sm:$0xff]  ;;  %v3112_v23 = vld [vmem:[%s3935_s12 + $0x60] ss:$12 sps:$4 sm:$0xff]   ;;  %vm3573_vm0 = vmmov 0   ;;  %v3982_v43 = vshrl.u32 %v597_v42, 7 }
 0x100   : > { %v3110_v21 = vld [vmem:[%s3935_s12 + $0x64] ss:$12 sps:$4 sm:$0xff]   ;;  %v553_v22 = vpack.c.bf16 %v550_v20, %v549_v18  ;;  %v3113_v24 = vld [vmem:[%s3935_s12 + $0x7c] ss:$12 sps:$4 sm:$0xff]   ;;  %v3116_v26 = vld [vmem:[%s3935_s12 + $0x94] ss:$12 sps:$4 sm:$0xff]  }
 0x101   : > { %v3115_v25 = vld [vmem:[%s3935_s12 + $0x78] ss:$12 sps:$4 sm:$0xff]   ;;  %v3118_v27 = vld [vmem:[%s3935_s12 + $0x90] ss:$12 sps:$4 sm:$0xff]   ;;  %v3121_v29 = vld [vmem:[%s3935_s12 + $0xa8] ss:$12 sps:$4 sm:$0xff]  }
 0x102   : > { %743 = vmatpush1.bf16.msra.mxu0 %v3103_v14  ;;  %2855 = vmatprep.mubr.bf16.mxu1 %v553_v22  ;;  %v3119_v28 = vld [vmem:[%s3935_s12 + $0xac] ss:$12 sps:$4 sm:$0xff]   ;;  %v551_v30 = vld [vmem:[#allocation2 + $0x10] sm:$0xff]  ;;  %v3122_v34 = vld [vmem:[%s3935_s12 + $0x8] ss:$12 sps:$4 sm:$0xff]   ;;  %v3985_v44 = vsub.s32 0, %v3982_v43 }
 0x103   : > { %744 = vmatprep.subr.bf16.mxu0 %v3104_v15  ;;  %v552_v31 = vld [vmem:[#allocation2 + $0x18] sm:$0xff]  ;;  %2839 = vmatprep.subr.bf16.mxu1 %v3122_v34  ;;  %v3124_v36 = vld [vmem:[%s3935_s12 + $0x38] ss:$12 sps:$4 sm:$0xff]   ;;  %v3125_v37 = vld [vmem:[%s3935_s12 + $0x50] ss:$12 sps:$4 sm:$0xff]   ;;  %v3991_v46 = vsub.s32 1, %v3982_v43 }
 0x104   : > { %v554_v32 = vpack.c.bf16 %v552_v31, %v551_v30  ;;  %v3123_v35 = vld [vmem:[%s3935_s12 + $0x20] ss:$12 sps:$4 sm:$0xff]   ;;  %2840 = vmatpush3.bf16.msra.mxu1 %v3122_v34  ;;  %v3126_v38 = vld [vmem:[%s3935_s12 + $0x68] ss:$12 sps:$4 sm:$0xff]   ;;  %v3128_v40 = vld [vmem:[%s3935_s12 + $0x98] ss:$12 sps:$4 sm:$0xff]  }
 0x105   : > { %2841 = vmatprep.subr.bf16.mxu1 %v3123_v35  ;;  %v3127_v39 = vld [vmem:[%s3935_s12 + $0x80] ss:$12 sps:$4 sm:$0xff]   ;;  %v3129_v41 = vld [vmem:[%s3935_s12 + $0xb0] ss:$12 sps:$4 sm:$0xff]   ;;  %vm857_vm1 = vcmask 261120   ;;  %s3574_s13 = smov 64  }
 0x106   : > { %745 = vmatpush1.bf16.msra.mxu0 %v3106_v16  ;;  %v3988_v45 = vld [vmem:[%s3947_s22] ss:$8 sm:$0x7]  ;;  %s3575_s20 = smov 96   ;;  %s3576_s17 = smov 32   ;;  %v607_v18 = vsub.s32 2, %v3982_v43 }
 0x107   : > { %746 = vmatprep.subr.bf16.mxu0 %v3107_v17  ;;  %v600_v47 = vrot.slane %v3988_v45, %v3985_v44  ;;  %v604_v49 = vrot.slane %v3988_v45, %v3991_v46  ;;  %s4469_s25 = sld [smem:[#allocation22_spill]]  ;;  %vm905_vm2 = vcmask 130048   ;;  %vm1355_vm3 = vcmask 523264   ;;  %p2751_p5 = scmp.ne.s32.totalorder %s3548_s30, 1 }
 0x108   : > { %2842 = vmatpush3.bf16.msra.mxu1 %v3123_v35  ;;  %v608_v20 = vrot.slane %v3988_v45, %v607_v18  ;;  %vm1358_vm4 = vcmask 785408  }
 0x109   : > { %2843 = vmatprep.subr.bf16.mxu1 %v3124_v36 }
 0x10a   : > { %747 = vmatpush1.bf16.msra.mxu0 %v3109_v19 }
 0x10b   : > { %748 = vmatprep.subr.bf16.mxu0 %v3110_v21 }
 0x10c   : > { %2844 = vmatpush3.bf16.msra.mxu1 %v3124_v36 }
 0x10d   : > { %2845 = vmatprep.subr.bf16.mxu1 %v3125_v37  ;;  %v852_v43 = vld [vmem:[%s4469_s25] sm:$0x3] }
 0x10e   : > { %749 = vmatpush1.bf16.msra.mxu0 %v3112_v23  ;;  %v856_v45 = vrot.slane %v852_v43, %v3985_v44 }
 0x10f   : > { %750 = vmatprep.subr.bf16.mxu0 %v3113_v24 }
 0x110   : > { %2846 = vmatpush3.bf16.msra.mxu1 %v3125_v37 }
 0x111   : > { %2847 = vmatprep.subr.bf16.mxu1 %v3126_v38 }
 0x112   : > { %751 = vmatpush1.bf16.msra.mxu0 %v3115_v25 }
 0x113   : > { %752 = vmatprep.subr.bf16.mxu0 %v3116_v26 }
 0x114   : > { %2848 = vmatpush3.bf16.msra.mxu1 %v3126_v38 }
 0x115   : > { %2849 = vmatprep.subr.bf16.mxu1 %v3127_v39 }
 0x116   : > { %753 = vmatpush1.bf16.msra.mxu0 %v3118_v27 }
 0x117   : > { %754 = vmatprep.subr.bf16.mxu0 %v3119_v28 }
 0x118   : > { %2850 = vmatpush3.bf16.msra.mxu1 %v3127_v39 }
 0x119   : > { %2851 = vmatprep.subr.bf16.mxu1 %v3128_v40 }
 0x11a   : > { %755 = vmatpush1.bf16.msra.mxu0 %v3121_v29 }
 0x11b   : > { %2859 = vmatprep.subr.bf16.mxu0 %v3572_v33 }
 0x11c   : > { %2852 = vmatpush3.bf16.msra.mxu1 %v3128_v40 }
 0x11d   : > { %773 = vmatmul.mubr.bf16.vlgmr.msra.gmra.mrb[0].mxu0 %v553_v22  ;;  %2853 = vmatprep.subr.bf16.mxu1 %v3129_v41 }
 0x11e   : > { %782 = vmatprep.mubr.bf16.mxu0 %v3571_v12 }
 0x120   : > { %2854 = vmatpush3.bf16.msra.mxu1 %v3129_v41 }
 0x121   : > { %2871 = vmatprep.subr.bf16.mxu1 %v3572_v33 }
 0x123   : > { %2856 = vmatmul.mubr.bf16.vlgmr.msra.gmra.mrb[0].mxu1 %v554_v32 }
 0x124   : > { %2873 = vmatprep.mubr.msk.bf16.mxu1 %vm3573_vm0, %v3572_v33 }
 0x125   : > { %783 = vmatmul.mubr.bf16.gmra.mrb[4].mxu0 %v554_v32 }
 0x126   : > { %2861 = vmatprep.mubr.msk.bf16.mxu0 %vm3573_vm0, %v3572_v33 }
 0x1f0   : > { %v774_v48 = vpop.f32.mrb[0].mxu0 }
 0x1f1   : > { %v775_v50 = vadd.f32 %v774_v48, %v600_v47  ;;  %v776_v51 = vpop.f32.mrb[1].mxu0 }
 0x1f2   : > { %v778_v52 = vpop.f32.mrb[2].mxu0  ;;  %v777_v55 = vadd.f32 %v776_v51, %v604_v49 }
 0x1f3   : > { %v779_v53 = vadd.f32 %v778_v52, %v600_v47  ;;  %v780_v54 = vpop.f32.mrb[3].mxu0  ;;  %v842_v57 = vmul.f32 0.17677669, %v775_v50 }
 0x1f4   : > { %v781_v56 = vadd.f32 %v780_v54, %v604_v49 }
 0x1f5   : > { %v843_v58 = vmul.f32 0.17677669, %v779_v53 }
 0x1f6   : > { %v848_v59 = vpack.c.bf16 %v781_v56, %v777_v55  ;;  %v2857_v21 = vpop.f32.mrb[0].mxu1 }
 0x1f7   : > { %v846_v60 = vpack.c.bf16 %v843_v58, %v842_v57  ;;  %v836_v23 = vadd.f32 %v2857_v21, %v608_v20  ;;  %v827_v24 = vpop.f32.mrb[1].mxu1 }
 0x1f8   : > { %1101 = vrot.lane.b32.xlu1 %v848_v59, %s3574_s13  ;;  %978 = vrot.lane.b32.xlu0 %v848_v59, %s3575_s20  ;;  %v862_v61 = vsel %vm857_vm1, %v848_v59, 0  ;;  %v784_v62 = vpop.f32.mrb[4].mxu0  ;;  %v828_v26 = vadd.f32 %v827_v24, %v608_v20  ;;  %v2858_v27 = vpop.f32.mrb[2].mxu1 }
 0x1f9   : > { %2860 = vmatpush3.bf16.xpose.msra.mxu0 %v862_v61  ;;  %v785_v63 = vadd.f32 %v784_v62, %v600_v47  ;;  %v786_v0 = vpop.f32.mrb[5].mxu0  ;;  %v839_v28 = vadd.f32 %v2858_v27, %v608_v20  ;;  %v830_v29 = vpop.f32.mrb[3].mxu1 }
 0x1fa   : > { %v787_v1 = vadd.f32 %v786_v0, %v604_v49  ;;  %v788_v2 = vpop.f32.mrb[6].mxu0  ;;  %2865 = vmatprep.subr.bf16.mxu0 %v3572_v33  ;;  %v831_v30 = vadd.f32 %v830_v29, %v608_v20 }
 0x1fb   : > { %v844_v3 = vmul.f32 0.17677669, %v785_v63  ;;  %v789_v4 = vadd.f32 %v788_v2, %v600_v47  ;;  %v790_v5 = vpop.f32.mrb[7].mxu0  ;;  %v4033_v32 = vpack.c.bf16 %v839_v28, %v836_v23 }
 0x1fc   : > { %1099 = vrot.lane.b32.xlu1 %v846_v60, %s3574_s13  ;;  %975 = vrot.lane.b32.xlu0 %v846_v60, %s3575_s20  ;;  %v791_v6 = vadd.f32 %v790_v5, %v604_v49  ;;  %v4035_v34 = vpack.c.bf16 %v831_v30, %v828_v26 }
 0x1fd   : > { %v845_v7 = vmul.f32 0.17677669, %v789_v4 }
 0x1fe   : > { %v850_v8 = vpack.c.bf16 %v791_v6, %v787_v1 }
 0x1ff   : > { %v847_v9 = vpack.c.bf16 %v845_v7, %v844_v3 }
 0x200   : > { %1221 = vrot.lane.b32.xlu1 %v846_v60, %s3576_s17  ;;  %1223 = vrot.lane.b32.xlu0 %v848_v59, %s3576_s17  ;;  %v1370_v25 = vsel %vm857_vm1, %v850_v8, 0 }
 0x201   : > { %2862 = vmatmul.mubr.msk.bf16.vlgmr.msra.gmra.mrb[8].mxu0 %vm857_vm1, %v846_v60 }
 0x202   : > { %2867 = vmatprep.mubr.msk.bf16.mxu0 %vm3573_vm0, %v3572_v33  ;;  %2866 = vmatpush3.bf16.msra.mxu0 %v4035_v34 }
 0x203   : > { %2877 = vmatprep.subr.bf16.mxu0 %v3572_v33 }
 0x204   : > { %1485 = vrot.lane.b32.xlu0 %v850_v8, %s3575_s20  ;;  %1482 = vrot.lane.b32.xlu1 %v847_v9, %s3575_s20 }
 0x208   : > { %1608 = vrot.lane.b32.xlu0 %v850_v8, %s3574_s13  ;;  %1606 = vrot.lane.b32.xlu1 %v847_v9, %s3574_s13 }
 0x20c   : > { %1730 = vrot.lane.b32.xlu0 %v850_v8, %s3576_s17  ;;  %1728 = vrot.lane.b32.xlu1 %v847_v9, %s3576_s17 }
 0x26a   : > { %v979_v10 = vpop.permute.xlu0 %978  ;;  %v1102_v13 = vpop.permute.xlu1 %1101 }
 0x26b   : > { %v984_v11 = vsel %vm857_vm1, %v979_v10, 0  ;;  %v1107_v15 = vsel %vm857_vm1, %v1102_v13, 0 }
 0x26c   : > { %2872 = vmatpush3.bf16.xpose.msra.mxu1 %v984_v11 }
 0x26d   : > { %2883 = vmatprep.subr.bf16.mxu1 %v3572_v33 }
 0x26e   : > { %v976_v14 = vpop.permute.xlu0 %975  ;;  %v1100_v17 = vpop.permute.xlu1 %1099 }
 0x272   : > { %v1224_v16 = vpop.permute.xlu0 %1223  ;;  %v1222_v22 = vpop.permute.xlu1 %1221 }
 0x273   : > { %2874 = vmatmul.mubr.msk.bf16.vlgmr.msra.gmra.mrb[4].mxu1 %vm857_vm1, %v976_v14  ;;  %v1229_v19 = vsel %vm857_vm1, %v1224_v16, 0 }
 0x274   : > { %2884 = vmatpush3.bf16.xpose.msra.mxu1 %v1107_v15  ;;  %2885 = vmatprep.mubr.msk.bf16.mxu1 %vm3573_vm0, %v3572_v33  ;;  %v1365_v15 = vrot.slane %v852_v43, %v3991_v46 }
 0x275   : > { %2895 = vmatprep.subr.bf16.mxu1 %v3572_v33 }
 0x276   : > { %v1486_v31 = vpop.permute.xlu0 %1485  ;;  %v1483_v37 = vpop.permute.xlu1 %1482 }
 0x277   : > { %v1491_v35 = vsel %vm857_vm1, %v1486_v31, 0 }
 0x27a   : > { %v1609_v36 = vpop.permute.xlu0 %1608  ;;  %v1607_v40 = vpop.permute.xlu1 %1606 }
 0x27b   : > { %2886 = vmatmul.mubr.msk.bf16.vlgmr.msra.gmra.mrb[8].mxu1 %vm857_vm1, %v1100_v17  ;;  %v1614_v38 = vsel %vm857_vm1, %v1609_v36, 0 }
 0x27c   : > { %2896 = vmatpush3.bf16.xpose.msra.mxu1 %v1229_v19  ;;  %2897 = vmatprep.mubr.msk.bf16.mxu1 %vm3573_vm0, %v3572_v33 }
 0x27d   : > { %2907 = vmatprep.subr.bf16.mxu1 %v3572_v33 }
 0x27e   : > { %v1731_v39 = vpop.permute.xlu0 %1730  ;;  %v1729_v42 = vpop.permute.xlu1 %1728 }
 0x27f   : > { %v1736_v41 = vsel %vm857_vm1, %v1731_v39, 0 }
 0x283   : > { %2898 = vmatmul.mubr.msk.bf16.vlgmr.msra.gmra.mrb[12].mxu1 %vm857_vm1, %v1222_v22 }
 0x284   : > { %2908 = vmatpush3.bf16.xpose.msra.mxu1 %v1370_v25  ;;  %2909 = vmatprep.mubr.msk.bf16.mxu1 %vm3573_vm0, %v3572_v33 }
 0x285   : > { %2919 = vmatprep.subr.bf16.mxu1 %v3572_v33 }
 0x28b   : > { %2910 = vmatmul.mubr.msk.bf16.vlgmr.msra.gmra.mrb[16].mxu1 %vm857_vm1, %v847_v9 }
 0x28c   : > { %2920 = vmatpush3.bf16.xpose.msra.mxu1 %v1491_v35  ;;  %2921 = vmatprep.mubr.msk.bf16.mxu1 %vm3573_vm0, %v3572_v33 }
 0x28d   : > { %2931 = vmatprep.subr.bf16.mxu1 %v3572_v33 }
 0x293   : > { %2922 = vmatmul.mubr.msk.bf16.vlgmr.msra.gmra.mrb[20].mxu1 %vm857_vm1, %v1483_v37 }
 0x294   : > { %2932 = vmatpush3.bf16.xpose.msra.mxu1 %v1614_v38  ;;  %2933 = vmatprep.mubr.msk.bf16.mxu1 %vm3573_vm0, %v3572_v33 }
 0x295   : > { %2943 = vmatprep.subr.bf16.mxu1 %v3572_v33 }
 0x29b   : > { %2934 = vmatmul.mubr.msk.bf16.vlgmr.msra.gmra.mrb[24].mxu1 %vm857_vm1, %v1607_v40 }
 0x29c   : > { %2944 = vmatpush3.bf16.xpose.msra.mxu1 %v1736_v41  ;;  %2945 = vmatprep.mubr.msk.bf16.mxu1 %vm3573_vm0, %v3572_v33 }
 0x2a3   : > { %2946 = vmatmul.mubr.msk.bf16.vlgmr.msra.gmra.mrb[28].mxu1 %vm857_vm1, %v1729_v42 }
 0x2d4   : > { %v898_v47 = vpop.f32.mrb[8].mxu0 }
 0x2d5   : > { %v4058_v48 = vadd.f32 %v898_v47, %v856_v45  ;;  %v2863_v49 = vpop.f32.mrb[9].mxu0 }
 0x2d6   : > { %v901_v50 = vpop.f32.mrb[10].mxu0 }
 0x2d7   : > { %v902_v51 = vadd.f32 %v901_v50, %v856_v45  ;;  %v2864_v52 = vpop.f32.mrb[11].mxu0  ;;  %v906_v53 = vsel %vm905_vm2, %v4058_v48, -inf }
 0x2d8   : > { %907 = vmax.xlane.f32.xlu0 %v906_v53 }
 0x2d9   : > { %v909_v54 = vsel %vm905_vm2, %v902_v51, -inf }
 0x2da   : > { %910 = vmax.xlane.f32.xlu1 %v909_v54 }
 0x346   : > { %v1020_v55 = vpop.f32.mrb[4].mxu1 }
 0x347   : > { %v4063_v56 = vadd.f32 %v1020_v55, %v856_v45  ;;  %v2875_v57 = vpop.f32.mrb[5].mxu1 }
 0x348   : > { %v1023_v58 = vpop.f32.mrb[6].mxu1 }
 0x349   : > { %v4065_v59 = vadd.f32 %v1023_v58, %v856_v45  ;;  %v2876_v60 = vpop.f32.mrb[7].mxu1  ;;  %v1027_v61 = vsel %vm905_vm2, %v4063_v56, -inf }
 0x34a   : > { %1028 = vmax.xlane.f32.xlu0 %v1027_v61 }
 0x34b   : > { %v1030_v62 = vsel %vm905_vm2, %v4065_v59, -inf }
 0x34e   : > { %v1143_v63 = vpop.f32.mrb[8].mxu1  ;;  %1031 = vmax.xlane.f32.xlu0 %v1030_v62 }
 0x34f   : > { %v4071_v0 = vadd.f32 %v1143_v63, %v856_v45  ;;  %v2887_v1 = vpop.f32.mrb[9].mxu1 }
 0x350   : > { %v1146_v2 = vpop.f32.mrb[10].mxu1 }
 0x351   : > { %v4073_v3 = vadd.f32 %v1146_v2, %v856_v45  ;;  %v2888_v4 = vpop.f32.mrb[11].mxu1  ;;  %v1150_v5 = vsel %vm905_vm2, %v4071_v0, -inf }
 0x352   : > { %1151 = vmax.xlane.f32.xlu1 %v1150_v5 }
 0x353   : > { %v1153_v6 = vsel %vm905_vm2, %v4073_v3, -inf }
 0x354   : > { %1154 = vmax.xlane.f32.xlu0 %v1153_v6 }
 0x356   : > { %v1265_v7 = vpop.f32.mrb[12].mxu1 }
 0x357   : > { %v4079_v8 = vadd.f32 %v1265_v7, %v856_v45  ;;  %v2899_v9 = vpop.f32.mrb[13].mxu1 }
 0x358   : > { %v1268_v10 = vpop.f32.mrb[14].mxu1 }
 0x359   : > { %v4081_v11 = vadd.f32 %v1268_v10, %v856_v45  ;;  %v2900_v13 = vpop.f32.mrb[15].mxu1  ;;  %v1272_v14 = vsel %vm905_vm2, %v4079_v8, -inf }
 0x35a   : > { %1273 = vmax.xlane.f32.xlu1 %v1272_v14 }
 0x35b   : > { %v1275_v16 = vsel %vm905_vm2, %v4081_v11, -inf }
 0x35c   : > { %1276 = vmax.xlane.f32.xlu0 %v1275_v16 }
 0x35e   : > { %v1406_v17 = vpop.f32.mrb[16].mxu1 }
 0x35f   : > { %v4088_v18 = vadd.f32 %v1406_v17, %v1365_v15  ;;  %v2911_v19 = vpop.f32.mrb[17].mxu1 }
 0x360   : > { %v1409_v20 = vpop.f32.mrb[18].mxu1 }
 0x361   : > { %v4090_v21 = vadd.f32 %v1409_v20, %v1365_v15  ;;  %v2912_v22 = vpop.f32.mrb[19].mxu1  ;;  %v1413_v61 = vsel %vm905_vm2, %v4088_v18, -inf }
 0x363   : > { %v1416_v23 = vsel %vm905_vm2, %v4090_v21, -inf }
 0x364   : > { %1417 = vmax.xlane.f32.xlu0 %v1416_v23 }
 0x365   : > { %v908_v57 = vpop.xlane.xlu0 %907 }
 0x366   : > { %v1527_v24 = vpop.f32.mrb[20].mxu1  ;;  %v912_v58 = vsub.f32 %v4058_v48, %v908_v57 }
 0x367   : > { %v4094_v25 = vadd.f32 %v1527_v24, %v1365_v15  ;;  %v911_v26 = vpop.xlane.xlu1 %910  ;;  %v2923_v27 = vpop.f32.mrb[21].mxu1 }
 0x368   : > { %v913_v28 = vsub.f32 %v902_v51, %v911_v26  ;;  %v1530_v29 = vpop.f32.mrb[22].mxu1  ;;  %v914_v60 = vmul.f32 1.442695, %v912_v58 }
 0x369   : > { %v4096_v30 = vadd.f32 %v1530_v29, %v1365_v15  ;;  %v2924_v31 = vpop.f32.mrb[23].mxu1  ;;  %v1534_v62 = vsel %vm905_vm2, %v4094_v25, -inf }
 0x36a   : > { %v916_v35 = vmul.f32 1.442695, %v913_v28 }
 0x36b   : > { %1051 = vrot.lane.b32.xlu1 %v4035_v34, %s3575_s20  ;;  %v1537_v36 = vsel %vm905_vm2, %v4096_v30, -inf }
 0x36c   : > { %3178 = vpow2.f32 %v916_v35  ;;  %1538 = vmax.xlane.f32.xlu0 %v1537_v36 }
 0x36d   : > { %3180 = vpow2.f32 %v914_v60 }
 0x36e   : > { %v1650_v37 = vpop.f32.mrb[24].mxu1 }
 0x36f   : > { %v4102_v38 = vadd.f32 %v1650_v37, %v1365_v15  ;;  %v2935_v39 = vpop.f32.mrb[25].mxu1 }
 0x370   : > { %v1653_v40 = vpop.f32.mrb[26].mxu1 }
 0x371   : > { %v4104_v41 = vadd.f32 %v1653_v40, %v1365_v15  ;;  %v2936_v42 = vpop.f32.mrb[27].mxu1  ;;  %v1657_v63 = vsel %vm905_vm2, %v4102_v38, -inf }
 0x373   : > { %v1660_v43 = vsel %vm905_vm2, %v4104_v41, -inf }
 0x374   : > { %1661 = vmax.xlane.f32.xlu0 %v1660_v43 }
 0x376   : > { %v4108_v45 = vpop.eup %3178  ;;  %v1772_v47 = vpop.f32.mrb[28].mxu1 }
 0x377   : > { %v4110_v49 = vadd.f32 %v1772_v47, %v1365_v15  ;;  %v2947_v50 = vpop.f32.mrb[29].mxu1  ;;  %v921_v51 = vsel %vm905_vm2, %v4108_v45, 0.0  ;;  %v4125_v1 = vpop.eup %3180 }
 0x378   : > { %v1775_v52 = vpop.f32.mrb[30].mxu1  ;;  %922 = vadd.xlane.f32.xlu0 %v921_v51  ;;  %v918_v2 = vsel %vm905_vm2, %v4125_v1, 0.0 }
 0x379   : > { %v4114_v53 = vadd.f32 %v1775_v52, %v1365_v15  ;;  %v2948_v54 = vpop.f32.mrb[31].mxu1  ;;  %v1779_v48 = vsel %vm905_vm2, %v4110_v49, -inf }
 0x37b   : > { %v1782_v55 = vsel %vm905_vm2, %v4114_v53, -inf }
 0x37c   : > { %1783 = vmax.xlane.f32.xlu0 %v1782_v55 }
 0x38f   : > { %1414 = vmax.xlane.f32.xlu1 %v1413_v61 }
 0x393   : > { %1535 = vmax.xlane.f32.xlu1 %v1534_v62 }
 0x397   : > { %1658 = vmax.xlane.f32.xlu1 %v1657_v63 }
 0x39b   : > { %919 = vadd.xlane.f32.xlu1 %v918_v2 }
 0x39f   : > { %1780 = vmax.xlane.f32.xlu1 %v1779_v48 }
 0x3d7   : > { %v1029_v4 = vpop.xlane.xlu0 %1028 }
 0x3d8   : > { %v1033_v5 = vsub.f32 %v4063_v56, %v1029_v4 }
 0x3da   : > { %v1035_v6 = vmul.f32 1.442695, %v1033_v5 }
 0x3db   : > { %v1032_v7 = vpop.xlane.xlu0 %1031 }
 0x3dc   : > { %3182 = vpow2.f32 %v1035_v6  ;;  %v1034_v9 = vsub.f32 %v4065_v59, %v1032_v7 }
 0x3de   : > { %v1037_v10 = vmul.f32 1.442695, %v1034_v9 }
 0x3df   : > { %v1152_v56 = vpop.xlane.xlu1 %1151 }
 0x3e0   : > { %3184 = vpow2.f32 %v1037_v10  ;;  %v1156_v59 = vsub.f32 %v4071_v0, %v1152_v56 }
 0x3e1   : > { %v1155_v17 = vpop.xlane.xlu0 %1154 }
 0x3e2   : > { %v1157_v20 = vsub.f32 %v4073_v3, %v1155_v17  ;;  %v1158_v22 = vmul.f32 1.442695, %v1156_v59 }
 0x3e4   : > { %v1160_v26 = vmul.f32 1.442695, %v1157_v20  ;;  %3186 = vpow2.f32 %v1158_v22 }
 0x3e6   : > { %v4133_v13 = vpop.eup %3182  ;;  %3188 = vpow2.f32 %v1160_v26 }
 0x3e7   : > { %v1039_v14 = vsel %vm905_vm2, %v4133_v13, 0.0  ;;  %v1274_v19 = vpop.xlane.xlu1 %1273 }
 0x3e8   : > { %1040 = vadd.xlane.f32.xlu1 %v1039_v14  ;;  %v1278_v23 = vsub.f32 %v4079_v8, %v1274_v19 }
 0x3e9   : > { %v1277_v24 = vpop.xlane.xlu0 %1276 }
 0x3ea   : > { %v4137_v15 = vpop.eup %3184  ;;  %v1280_v27 = vmul.f32 1.442695, %v1278_v23  ;;  %v1279_v28 = vsub.f32 %v4081_v11, %v1277_v24 }
 0x3eb   : > { %v1042_v16 = vsel %vm905_vm2, %v4137_v15, 0.0  ;;  %v4150_v35 = vpop.permute.xlu1 %1051 }
 0x3ec   : > { %1043 = vadd.xlane.f32.xlu0 %v1042_v16  ;;  %3190 = vpow2.f32 %v1280_v27 }
 0x3ee   : > { %v4152_v36 = vpop.eup %3186 }
 0x3ef   : > { %v1162_v11 = vsel %vm905_vm2, %v4152_v36, 0.0 }
 0x3f0   : > { %v4154_v8 = vpop.eup %3188 }
 0x3f1   : > { %v1418_v29 = vpop.xlane.xlu0 %1417  ;;  %v1165_v50 = vsel %vm905_vm2, %v4154_v8, 0.0 }
 0x3f2   : > { %v1420_v31 = vsub.f32 %v4090_v21, %v1418_v29 }
 0x3f4   : > { %v1423_v0 = vmul.f32 1.442695, %v1420_v31 }
 0x3f6   : > { %v4158_v40 = vpop.eup %3190 }
 0x3f7   : > { %v1284_v51 = vsel %vm905_vm2, %v4158_v40, 0.0 }
 0x3f9   : > { %1295 = vrot.lane.b32.xlu1 %v4035_v34, %s3576_s17  ;;  %v1539_v3 = vpop.xlane.xlu0 %1538 }
 0x3fa   : > { %v1541_v21 = vsub.f32 %v4096_v30, %v1539_v3 }
 0x401   : > { %v1662_v37 = vpop.xlane.xlu0 %1661 }
 0x402   : > { %1173 = vrot.lane.b32.xlu0 %v4035_v34, %s3574_s13  ;;  %v1282_v34 = vmul.f32 1.442695, %v1279_v28  ;;  %v1664_v57 = vsub.f32 %v4104_v41, %v1662_v37 }
 0x404   : > { %3192 = vpow2.f32 %v1282_v34  ;;  %v1667_v62 = vmul.f32 1.442695, %v1664_v57 }
 0x405   : > { %3194 = vpow2.f32 %v1423_v0  ;;  %v923_v55 = vpop.xlane.xlu0 %922 }
 0x409   : > { %v1784_v63 = vpop.xlane.xlu0 %1783 }
 0x40a   : > { %v1786_v48 = vsub.f32 %v4114_v53, %v1784_v63 }
 0x40c   : > { %v1789_v9 = vmul.f32 1.442695, %v1786_v48 }
 0x40e   : > { %v4166_v52 = vpop.eup %3192 }
 0x40f   : > { %v1287_v60 = vsel %vm905_vm2, %v4166_v52, 0.0  ;;  %v4172_v61 = vpop.eup %3194 }
 0x410   : > { %v1428_v2 = vsel %vm905_vm2, %v4172_v61, 0.0 }
 0x41c   : > { %v1415_v39 = vpop.xlane.xlu1 %1414 }
 0x41d   : > { %v1419_v42 = vsub.f32 %v4088_v18, %v1415_v39  ;;  %1163 = vadd.xlane.f32.xlu1 %v1162_v11  ;;  %v1544_v18 = vmul.f32 1.442695, %v1541_v21 }
 0x41f   : > { %v1421_v43 = vmul.f32 1.442695, %v1419_v42 }
 0x420   : > { %v1536_v47 = vpop.xlane.xlu1 %1535 }
 0x421   : > { %3196 = vpow2.f32 %v1421_v43  ;;  %v1540_v54 = vsub.f32 %v4094_v25, %v1536_v47  ;;  %1166 = vadd.xlane.f32.xlu0 %v1165_v50  ;;  %1285 = vadd.xlane.f32.xlu1 %v1284_v51 }
 0x423   : > { %v1542_v30 = vmul.f32 1.442695, %v1540_v54 }
 0x424   : > { %v1659_v58 = vpop.xlane.xlu1 %1658 }
 0x425   : > { %3198 = vpow2.f32 %v1542_v30  ;;  %1288 = vadd.xlane.f32.xlu0 %v1287_v60  ;;  %v1663_v26 = vsub.f32 %v4102_v38, %v1659_v58 }
 0x426   : > { %3200 = vpow2.f32 %v1544_v18 }
 0x427   : > { %3202 = vrcp.f32 %v923_v55  ;;  %v1665_v27 = vmul.f32 1.442695, %v1663_v26 }
 0x428   : > { %v920_v25 = vpop.xlane.xlu1 %919 }
 0x429   : > { %1429 = vadd.xlane.f32.xlu0 %v1428_v2  ;;  %3204 = vrcp.f32 %v920_v25 }
 0x42a   : > { %3206 = vpow2.f32 %v1667_v62 }
 0x42b   : > { %v4176_v41 = vpop.eup %3196 }
 0x42c   : > { %v1781_v4 = vpop.xlane.xlu1 %1780  ;;  %v1425_v5 = vsel %vm905_vm2, %v4176_v41, 0.0 }
 0x42d   : > { %v1785_v6 = vsub.f32 %v4110_v49, %v1781_v4  ;;  %1426 = vadd.xlane.f32.xlu1 %v1425_v5 }
 0x42f   : > { %v4182_v7 = vpop.eup %3198  ;;  %v1787_v10 = vmul.f32 1.442695, %v1785_v6 }
 0x430   : > { %v1546_v14 = vsel %vm905_vm2, %v4182_v7, 0.0  ;;  %v4186_v16 = vpop.eup %3200 }
 0x431   : > { %3208 = vpow2.f32 %v1787_v10  ;;  %1547 = vadd.xlane.f32.xlu0 %v1546_v14  ;;  %v3203_v56 = vpop.eup %3202  ;;  %v1549_v59 = vsel %vm905_vm2, %v4186_v16, 0.0 }
 0x432   : > { %3210 = vpow2.f32 %v1789_v9  ;;  %v927_v49 = vmul.f32 %v3203_v56, %v4108_v45 }
 0x433   : > { %v3205_v53 = vpop.eup %3204  ;;  %3212 = vpow2.f32 %v1665_v27 }
 0x434   : > { %v4190_v17 = vpop.eup %3206  ;;  %v926_v19 = vmul.f32 %v3205_v53, %v4125_v1 }
 0x435   : > { %1550 = vadd.xlane.f32.xlu0 %v1549_v59  ;;  %v1672_v22 = vsel %vm905_vm2, %v4190_v17, 0.0 }
 0x436   : > { %v928_v20 = vpack.c.bf16 %v927_v49, %v926_v19 }
 0x438   : > { %2868 = vmatmul.mubr.msk.bf16.vlgmr.msra.gmra.mrb[12].mxu0 %vm905_vm2, %v928_v20 }
 0x439   : > { %1673 = vadd.xlane.f32.xlu0 %v1672_v22  ;;  %2878 = vmatpush3.bf16.msra.mxu0 %v4150_v35 }
 0x43a   : > { %2879 = vmatprep.mubr.msk.bf16.mxu0 %vm3573_vm0, %v3572_v33  ;;  %2889 = vmatprep.subr.bf16.mxu0 %v3572_v33 }
 0x43b   : > { %v4200_v23 = vpop.eup %3208 }
 0x43c   : > { %v1791_v45 = vsel %vm905_vm2, %v4200_v23, 0.0  ;;  %v4205_v1 = vpop.eup %3210 }
 0x43d   : > { %1792 = vadd.xlane.f32.xlu0 %v1791_v45  ;;  %v1794_v24 = vsel %vm905_vm2, %v4205_v1, 0.0  ;;  %v4214_v28 = vpop.eup %3212 }
 0x43e   : > { %1558 = vrot.lane.b32.xlu1 %v4033_v32, %s3575_s20  ;;  %v1669_v29 = vsel %vm905_vm2, %v4214_v28, 0.0 }
 0x441   : > { %1795 = vadd.xlane.f32.xlu0 %v1794_v24 }
 0x457   : > { %1680 = vrot.lane.b32.xlu0 %v4033_v32, %s3574_s13 }
 0x462   : > { %1670 = vadd.xlane.f32.xlu1 %v1669_v29 }
 0x473   : > { %1802 = vrot.lane.b32.xlu1 %v4033_v32, %s3576_s17 }
 0x475   : > { %v1041_v34 = vpop.xlane.xlu1 %1040 }
 0x476   : > { %3214 = vrcp.f32 %v1041_v34 }
 0x479   : > { %v1044_v31 = vpop.xlane.xlu0 %1043  ;;  %v1296_v11 = vpop.permute.xlu1 %1295 }
 0x47a   : > { %3216 = vrcp.f32 %v1044_v31 }
 0x47d   : > { %v1174_v39 = vpop.permute.xlu0 %1173 }
 0x480   : > { %v3215_v0 = vpop.eup %3214 }
 0x481   : > { %v1047_v35 = vmul.f32 %v3215_v0, %v4133_v13 }
 0x484   : > { %v3217_v38 = vpop.eup %3216 }
 0x485   : > { %v1048_v3 = vmul.f32 %v3217_v38, %v4137_v15 }
 0x487   : > { %v1049_v37 = vpack.c.bf16 %v1048_v3, %v1047_v35 }
 0x489   : > { %2880 = vmatmul.mubr.msk.bf16.vlgmr.msra.gmra.mrb[16].mxu0 %vm905_vm2, %v1049_v37 }
 0x48a   : > { %2890 = vmatpush3.bf16.msra.mxu0 %v1174_v39  ;;  %2891 = vmatprep.mubr.msk.bf16.mxu0 %vm3573_vm0, %v3572_v33 }
 0x48b   : > { %2901 = vmatprep.subr.bf16.mxu0 %v3572_v33 }
 0x4aa   : > { %v1164_v42 = vpop.xlane.xlu1 %1163 }
 0x4ab   : > { %3218 = vrcp.f32 %v1164_v42 }
 0x4ae   : > { %v1167_v21 = vpop.xlane.xlu0 %1166  ;;  %v1286_v43 = vpop.xlane.xlu1 %1285 }
 0x4af   : > { %3220 = vrcp.f32 %v1167_v21 }
 0x4b2   : > { %v1289_v47 = vpop.xlane.xlu0 %1288 }
 0x4b3   : > { %3222 = vrcp.f32 %v1289_v47 }
 0x4b4   : > { %3224 = vrcp.f32 %v1286_v43 }
 0x4b5   : > { %v3219_v13 = vpop.eup %3218 }
 0x4b6   : > { %v1170_v50 = vmul.f32 %v3219_v13, %v4152_v36  ;;  %v1430_v54 = vpop.xlane.xlu0 %1429 }
 0x4b9   : > { %v3221_v15 = vpop.eup %3220 }
 0x4ba   : > { %v1171_v51 = vmul.f32 %v3221_v15, %v4154_v8  ;;  %v1427_v55 = vpop.xlane.xlu1 %1426  ;;  %v3130_v15 = vld [vmem:[%s3941_s6] sm:$0xff]  }
 0x4bb   : > { %3226 = vrcp.f32 %v1427_v55  ;;  %2955 = vmatprep.subr.bf16.mxu1 %v3130_v15 }
 0x4bc   : > { %v1172_v18 = vpack.c.bf16 %v1171_v51, %v1170_v50  ;;  %3228 = vrcp.f32 %v1430_v54  ;;  %v3131_v50 = vld [vmem:[%s3941_s6 + $0x8] sm:$0xff]   ;;  %2956 = vmatpush3.bf16.msra.mxu1 %v3130_v15 }
 0x4bd   : > { %v3223_v57 = vpop.eup %3222  ;;  %2957 = vmatprep.subr.bf16.mxu1 %v3131_v50 }
 0x4be   : > { %v1548_v30 = vpop.xlane.xlu0 %1547  ;;  %2892 = vmatmul.mubr.msk.bf16.vlgmr.msra.gmra.mrb[20].mxu0 %vm905_vm2, %v1172_v18  ;;  %v3225_v58 = vpop.eup %3224  ;;  %v1293_v60 = vmul.f32 %v3223_v57, %v4166_v52  ;;  %v3132_v57 = vld [vmem:[%s3941_s6 + $0x10] sm:$0xff]  }
 0x4bf   : > { %2902 = vmatpush3.bf16.msra.mxu0 %v1296_v11  ;;  %2903 = vmatprep.mubr.msk.bf16.mxu0 %vm3573_vm0, %v3572_v33  ;;  %v1292_v36 = vmul.f32 %v3225_v58, %v4158_v40  ;;  %v1559_v6 = vpop.permute.xlu1 %1558  ;;  %v3133_v58 = vld [vmem:[%s3941_s6 + $0x18] sm:$0xff]  }
 0x4c0   : > { %2913 = vmatprep.subr.bf16.mxu0 %v3572_v33  ;;  %2958 = vmatpush3.bf16.msra.mxu1 %v3131_v50 }
 0x4c1   : > { %v1294_v62 = vpack.c.bf16 %v1293_v60, %v1292_v36  ;;  %2959 = vmatprep.subr.bf16.mxu1 %v3132_v57 }
 0x4c2   : > { %v1551_v8 = vpop.xlane.xlu0 %1550 }
 0x4c3   : > { %3230 = vrcp.f32 %v1551_v8 }
 0x4c4   : > { %3232 = vrcp.f32 %v1548_v30  ;;  %2960 = vmatpush3.bf16.msra.mxu1 %v3132_v57 }
 0x4c5   : > { %v3227_v63 = vpop.eup %3226  ;;  %2961 = vmatprep.subr.bf16.mxu1 %v3133_v58 }
 0x4c6   : > { %v1674_v25 = vpop.xlane.xlu0 %1673  ;;  %2904 = vmatmul.mubr.msk.bf16.vlgmr.msra.gmra.mrb[24].mxu0 %vm905_vm2, %v1294_v62  ;;  %v3229_v2 = vpop.eup %3228  ;;  %v1433_v52 = vmul.f32 %v3227_v63, %v4176_v41  ;;  %v3134_v63 = vld [vmem:[%s3941_s6 + $0x20] sm:$0xff]  }
 0x4c7   : > { %2914 = vmatpush3.bf16.msra.mxu0 %v4033_v32  ;;  %2915 = vmatprep.mubr.msk.bf16.mxu0 %vm3573_vm0, %v3572_v33  ;;  %v1434_v40 = vmul.f32 %v3229_v2, %v4172_v61  ;;  %3234 = vrcp.f32 %v1674_v25  ;;  %v3135_v25 = vld [vmem:[%s3941_s6 + $0x28] sm:$0xff]   ;;  %v3136_v2 = vld [vmem:[%s3941_s6 + $0x30] sm:$0xff]  }
 0x4c8   : > { %2925 = vmatprep.subr.bf16.mxu0 %v3572_v33  ;;  %2962 = vmatpush3.bf16.msra.mxu1 %v3133_v58 }
 0x4c9   : > { %v1435_v4 = vpack.c.bf16 %v1434_v40, %v1433_v52  ;;  %2963 = vmatprep.subr.bf16.mxu1 %v3134_v63  ;;  %v3137_v52 = vld [vmem:[%s3941_s6 + $0x38] sm:$0xff]  }
 0x4ca   : > { %v1793_v48 = vpop.xlane.xlu0 %1792 }
 0x4cc   : > { %2964 = vmatpush3.bf16.msra.mxu1 %v3134_v63 }
 0x4cd   : > { %v3231_v5 = vpop.eup %3230  ;;  %2965 = vmatprep.subr.bf16.mxu1 %v3135_v25 }
 0x4ce   : > { %2916 = vmatmul.mubr.msk.bf16.vlgmr.msra.gmra.mrb[28].mxu0 %vm905_vm2, %v1435_v4  ;;  %v3233_v9 = vpop.eup %3232  ;;  %v1555_v32 = vmul.f32 %v3231_v5, %v4186_v16  ;;  %v1796_v10 = vpop.xlane.xlu0 %1795 }
 0x4cf   : > { %2926 = vmatpush3.bf16.msra.mxu0 %v1559_v6  ;;  %2927 = vmatprep.mubr.msk.bf16.mxu0 %vm3573_vm0, %v3572_v33  ;;  %v1554_v41 = vmul.f32 %v3233_v9, %v4182_v7 }
 0x4d0   : > { %2937 = vmatprep.subr.bf16.mxu0 %v3572_v33  ;;  %2966 = vmatpush3.bf16.msra.mxu1 %v3135_v25 }
 0x4d1   : > { %v1556_v14 = vpack.c.bf16 %v1555_v32, %v1554_v41  ;;  %v3235_v16 = vpop.eup %3234  ;;  %2967 = vmatprep.subr.bf16.mxu1 %v3136_v2 }
 0x4d2   : > { %v1681_v61 = vpop.permute.xlu0 %1680  ;;  %v1678_v59 = vmul.f32 %v3235_v16, %v4190_v17 }
 0x4d4   : > { %2968 = vmatpush3.bf16.msra.mxu1 %v3136_v2  ;;  %v3146_v2 = vld [vmem:[%s3943_s29 + $0x24] ss:$8 sps:$4 sm:$0xff]  }
 0x4d5   : > { %2969 = vmatprep.subr.bf16.mxu1 %v3137_v52 }
 0x4d6   : > { %2928 = vmatmul.mubr.msk.bf16.vlgmr.msra.gmra.mrb[32].mxu0 %vm905_vm2, %v1556_v14 }
 0x4d7   : > { %2938 = vmatpush3.bf16.msra.mxu0 %v1681_v61  ;;  %2939 = vmatprep.mubr.msk.bf16.mxu0 %vm3573_vm0, %v3572_v33 }
 0x4d8   : > { %2949 = vmatprep.subr.bf16.mxu0 %v3572_v33  ;;  %2970 = vmatpush3.bf16.msra.mxu1 %v3137_v52  ;;  %v3144_v52 = vld [vmem:[%s3943_s29 + $0x20] ss:$8 sps:$4 sm:$0xff]  }
 0x4ef   : > { %v1671_v56 = vpop.xlane.xlu1 %1670 }
 0x4f0   : > { %3236 = vrcp.f32 %v1671_v56 }
 0x4f1   : > { %3238 = vrcp.f32 %v1796_v10 }
 0x4f2   : > { %3240 = vrcp.f32 %v1793_v48 }
 0x4f3   : > { %v1803_v20 = vpop.permute.xlu1 %1802 }
 0x4fa   : > { %v3237_v53 = vpop.eup %3236 }
 0x4fb   : > { %v1677_v7 = vmul.f32 %v3237_v53, %v4214_v28  ;;  %v3239_v19 = vpop.eup %3238 }
 0x4fc   : > { %v3241_v22 = vpop.eup %3240  ;;  %v1800_v45 = vmul.f32 %v3239_v19, %v4205_v1 }
 0x4fd   : > { %v1679_v49 = vpack.c.bf16 %v1678_v59, %v1677_v7  ;;  %v1799_v24 = vmul.f32 %v3241_v22, %v4200_v23 }
 0x4ff   : > { %2940 = vmatmul.mubr.msk.bf16.vlgmr.msra.gmra.mrb[36].mxu0 %vm905_vm2, %v1679_v49  ;;  %v1801_v26 = vpack.c.bf16 %v1800_v45, %v1799_v24 }
 0x500   : > { %2950 = vmatpush3.bf16.msra.mxu0 %v1803_v20  ;;  %2951 = vmatprep.mubr.msk.bf16.mxu0 %vm3573_vm0, %v3572_v33 }
 0x507   : > { %2952 = vmatmul.mubr.msk.bf16.vlgmr.msra.gmra.mrb[40].mxu0 %vm905_vm2, %v1801_v26  ;;  %v558_v26 = vld [vmem:[%s3947_s22 + $0x2] ss:$0 sm:$0xff] }
 0x508   : > { %2178 = vmatprep.mubr.bf16.mxu0 %v3571_v12 }
 0x50b   : > { %v4260_v17 = vpop.f32.mrb[12].mxu0 }
 0x50c   : > { %v2869_v27 = vpop.f32.mrb[13].mxu0 }
 0x50d   : > { %v4262_v28 = vpop.f32.mrb[14].mxu0 }
 0x50e   : > { %v973_v29 = vpack.c.bf16 %v4262_v28, %v4260_v17  ;;  %v2870_v34 = vpop.f32.mrb[15].mxu0 }
 0x55c   : > { %v1091_v31 = vpop.f32.mrb[16].mxu0 }
 0x55d   : > { %v2881_v33 = vpop.f32.mrb[17].mxu0 }
 0x55e   : > { %v1094_v0 = vpop.f32.mrb[18].mxu0 }
 0x55f   : > { %v1098_v1 = vpack.c.bf16 %v1094_v0, %v1091_v31  ;;  %v2882_v23 = vpop.f32.mrb[19].mxu0  ;;  %v3258_v0 = vld [vmem:[#allocation2] sm:$0xff] }
 0x560   : > { %v3259_v23 = vld [vmem:[#allocation2 + $0x8] sm:$0xff] }
 0x561   : > { %1344 = vrot.lane.b32.xlu1 %v1098_v1, %s3576_s17 }
 0x591   : > { %v1213_v38 = vpop.f32.mrb[20].mxu0 }
 0x592   : > { %v2893_v35 = vpop.f32.mrb[21].mxu0 }
 0x593   : > { %v1216_v3 = vpop.f32.mrb[22].mxu0 }
 0x594   : > { %v1220_v37 = vpack.c.bf16 %v1216_v3, %v1213_v38  ;;  %v2894_v39 = vpop.f32.mrb[23].mxu0  ;;  %v3260_v3 = vld [vmem:[#allocation2 + $0x10] sm:$0xff] }
 0x595   : > { %v3261_v39 = vld [vmem:[#allocation2 + $0x18] sm:$0xff] }
 0x596   : > { %1347 = vrot.lane.b32.xlu1 %v1220_v37, %s3574_s13 }
 0x599   : > { %v1335_v11 = vpop.f32.mrb[24].mxu0 }
 0x59a   : > { %v2905_v42 = vpop.f32.mrb[25].mxu0 }
 0x59b   : > { %v1338_v21 = vpop.f32.mrb[26].mxu0  ;;  %v3138_v42 = vld [vmem:[%s3943_s29] ss:$8 sps:$4 sm:$0xff]  }
 0x59c   : > { %v1342_v43 = vpack.c.bf16 %v1338_v21, %v1335_v11  ;;  %v2906_v47 = vpop.f32.mrb[27].mxu0  ;;  %v3140_v21 = vld [vmem:[%s3943_s29 + $0x4] ss:$8 sps:$4 sm:$0xff]  }
 0x59d   : > { %2146 = vmatprep.subr.bf16.mxu0 %v3140_v21  ;;  %v3141_v47 = vld [vmem:[%s3943_s29 + $0x10] ss:$8 sps:$4 sm:$0xff]   ;;  %v561_v21 = vld [vmem:[%s3947_s22 + $0x5] ss:$0 sm:$0xff] }
 0x59e   : > { %1350 = vrot.lane.b32.xlu1 %v1342_v43, %s3575_s20  ;;  %v3143_v43 = vld [vmem:[%s3943_s29 + $0x14] ss:$8 sps:$4 sm:$0xff]   ;;  %2147 = vmatpush1.bf16.msra.mxu0 %v3138_v42 }
 0x59f   : > { %2148 = vmatprep.subr.bf16.mxu0 %v3143_v43 }
 0x5a1   : > { %v1473_v13 = vpop.f32.mrb[28].mxu0 }
 0x5a2   : > { %v2917_v51 = vpop.f32.mrb[29].mxu0  ;;  %2149 = vmatpush1.bf16.msra.mxu0 %v3141_v47 }
 0x5a3   : > { %v1476_v54 = vpop.f32.mrb[30].mxu0  ;;  %2150 = vmatprep.subr.bf16.mxu0 %v3146_v2 }
 0x5a4   : > { %v1480_v55 = vpack.c.bf16 %v1476_v54, %v1473_v13  ;;  %v2918_v18 = vpop.f32.mrb[31].mxu0 }
 0x5a6   : > { %2151 = vmatpush1.bf16.msra.mxu0 %v3144_v52 }
 0x5a9   : > { %v1598_v30 = vpop.f32.mrb[32].mxu0 }
 0x5aa   : > { %v2929_v60 = vpop.f32.mrb[33].mxu0 }
 0x5ab   : > { %v1601_v36 = vpop.f32.mrb[34].mxu0 }
 0x5ac   : > { %v1605_v8 = vpack.c.bf16 %v1601_v36, %v1598_v30  ;;  %v2930_v62 = vpop.f32.mrb[35].mxu0 }
 0x5ae   : > { %1851 = vrot.lane.b32.xlu1 %v1605_v8, %s3576_s17 }
 0x5d2   : > { %v1720_v40 = vpop.f32.mrb[36].mxu0 }
 0x5d3   : > { %v2941_v48 = vpop.f32.mrb[37].mxu0  ;;  %v1345_v61 = vpop.permute.xlu1 %1344 }
 0x5d4   : > { %v1723_v4 = vpop.f32.mrb[38].mxu0  ;;  %v1354_v16 = vsel %vm857_vm1, %v973_v29, %v1345_v61  ;;  %v3147_v48 = vld [vmem:[%s3943_s29 + $0x30] ss:$8 sps:$4 sm:$0xff]   ;;  %v3162_v61 = vld [vmem:[%s3945_s2 + $0x40] sm:$0xff]  }
 0x5d5   : > { %v1727_v5 = vpack.c.bf16 %v1723_v4, %v1720_v40  ;;  %v2942_v6 = vpop.f32.mrb[39].mxu0  ;;  %v3149_v40 = vld [vmem:[%s3943_s29 + $0x34] ss:$8 sps:$4 sm:$0xff]   ;;  %v3152_v4 = vld [vmem:[%s3943_s29 + $0x44] ss:$8 sps:$4 sm:$0xff]   ;;  %2811 = vmatprep.subr.bf16.mxu1 %v3162_v61 }
 0x5d6   : > { %2152 = vmatprep.subr.bf16.mxu0 %v3149_v40  ;;  %v3155_v6 = vld [vmem:[%s3943_s29 + $0x54] ss:$8 sps:$4 sm:$0xff]  }
 0x5d7   : > { %1854 = vrot.lane.b32.xlu0 %v1727_v5, %s3574_s13  ;;  %2153 = vmatpush1.bf16.msra.mxu0 %v3147_v48  ;;  %v3150_v5 = vld [vmem:[%s3943_s29 + $0x40] ss:$8 sps:$4 sm:$0xff]  }
 0x5d8   : > { %2154 = vmatprep.subr.bf16.mxu0 %v3152_v4 }
 0x5da   : > { %v1842_v9 = vpop.f32.mrb[40].mxu0 }
 0x5db   : > { %v2953_v32 = vpop.f32.mrb[41].mxu0  ;;  %2155 = vmatpush1.bf16.msra.mxu0 %v3150_v5 }
 0x5dc   : > { %v1845_v10 = vpop.f32.mrb[42].mxu0  ;;  %2156 = vmatprep.subr.bf16.mxu0 %v3155_v6  ;;  %v3156_v32 = vld [vmem:[%s3943_s29 + $0x60] ss:$8 sps:$4 sm:$0xff]  }
 0x5dd   : > { %v1849_v41 = vpack.c.bf16 %v1845_v10, %v1842_v9  ;;  %v2954_v14 = vpop.f32.mrb[43].mxu0  ;;  %v3153_v9 = vld [vmem:[%s3943_s29 + $0x50] ss:$8 sps:$4 sm:$0xff]   ;;  %v3158_v10 = vld [vmem:[%s3943_s29 + $0x64] ss:$8 sps:$4 sm:$0xff]  }
 0x5de   : > { %v3159_v14 = vld [vmem:[%s3943_s29 + $0x70] ss:$8 sps:$4 sm:$0xff]  }
 0x5df   : > { %1857 = vrot.lane.b32.xlu1 %v1849_v41, %s3575_s20  ;;  %2157 = vmatpush1.bf16.msra.mxu0 %v3153_v9  ;;  %v3161_v41 = vld [vmem:[%s3943_s29 + $0x74] ss:$8 sps:$4 sm:$0xff]  }
 0x5e0   : > { %2158 = vmatprep.subr.bf16.mxu0 %v3158_v10 }
 0x5e3   : > { %2159 = vmatpush1.bf16.msra.mxu0 %v3156_v32 }
 0x5e4   : > { %2160 = vmatprep.subr.bf16.mxu0 %v3161_v41 }
 0x5e7   : > { %2161 = vmatpush1.bf16.msra.mxu0 %v3159_v14 }
 0x608   : > { %v1348_v56 = vpop.permute.xlu1 %1347 }
 0x609   : > { %v1357_v53 = vsel %vm1355_vm3, %v1354_v16, %v1348_v56  ;;  %v3163_v56 = vld [vmem:[%s3945_s2] sm:$0xff]   ;;  %v3164_v16 = vld [vmem:[%s3945_s2 + $0x48] sm:$0xff]  }
 0x610   : > { %v1351_v59 = vpop.permute.xlu1 %1350 }
 0x611   : > { %v1360_v7 = vsel %vm1358_vm4, %v1357_v53, %v1351_v59  ;;  %v3165_v53 = vld [vmem:[%s3945_s2 + $0x8] sm:$0xff]   ;;  %v3166_v59 = vld [vmem:[%s3945_s2 + $0x50] sm:$0xff]  }
 0x612   : > { %2971 = vmatprep.mubr.bf16.mxu1 %v1360_v7  ;;  %v3167_v7 = vld [vmem:[%s3945_s2 + $0x10] sm:$0xff]  }
 0x620   : > { %v1852_v49 = vpop.permute.xlu1 %1851 }
 0x621   : > { %v1861_v20 = vsel %vm857_vm1, %v1480_v55, %v1852_v49  ;;  %v3168_v49 = vld [vmem:[%s3945_s2 + $0x58] sm:$0xff]  }
 0x649   : > { %v1855_v19 = vpop.permute.xlu0 %1854 }
 0x64a   : > { %v1863_v22 = vsel %vm1355_vm3, %v1861_v20, %v1855_v19  ;;  %v3169_v19 = vld [vmem:[%s3945_s2 + $0x18] sm:$0xff]   ;;  %v3170_v20 = vld [vmem:[%s3945_s2 + $0x60] sm:$0xff]  }
 0x651   : > { %v1858_v45 = vpop.permute.xlu1 %1857 }
 0x652   : > { %v1865_v24 = vsel %vm1358_vm4, %v1863_v22, %v1858_v45  ;;  %v3171_v22 = vld [vmem:[%s3945_s2 + $0x20] sm:$0xff]   ;;  %v3172_v45 = vld [vmem:[%s3945_s2 + $0x68] sm:$0xff]  }
 0x653   : > { %2972 = vmatmul.mubr.bf16.vlgmr.msra.gmra.mrb[32].mxu1 %v1865_v24 }
 0x654   : > { %2812 = vmatpush3.bf16.msra.mxu1 %v3163_v56 }
 0x655   : > { %2813 = vmatprep.subr.bf16.mxu1 %v3164_v16 }
 0x658   : > { %2814 = vmatpush3.bf16.msra.mxu1 %v3165_v53 }
 0x659   : > { %2815 = vmatprep.subr.bf16.mxu1 %v3166_v59 }
 0x65c   : > { %2816 = vmatpush3.bf16.msra.mxu1 %v3167_v7 }
 0x65d   : > { %2817 = vmatprep.subr.bf16.mxu1 %v3168_v49 }
 0x660   : > { %2818 = vmatpush3.bf16.msra.mxu1 %v3169_v19 }
 0x661   : > { %2819 = vmatprep.subr.bf16.mxu1 %v3170_v20 }
 0x664   : > { %2820 = vmatpush3.bf16.msra.mxu1 %v3171_v22 }
 0x665   : > { %2821 = vmatprep.subr.bf16.mxu1 %v3172_v45 }
 0x726   : > { %v2973_v27 = vpop.f32.mrb[32].mxu1 }
 0x727   : > { %v1965_v34 = vpop.f32.mrb[33].mxu1  ;;  %v1974_v28 = vadd.f32 %v2973_v27, %v558_v26 }
 0x728   : > { %v1966_v31 = vadd.f32 %v1965_v34, %v558_v26  ;;  %v2974_v33 = vpop.f32.mrb[34].mxu1 }
 0x729   : > { %v1968_v17 = vpop.f32.mrb[35].mxu1  ;;  %v1977_v35 = vadd.f32 %v2974_v33, %v558_v26  ;;  %v1982_v37 = vadd.f32 %v3260_v3, %v1974_v28 }
 0x72a   : > { %v1969_v29 = vadd.f32 %v1968_v17, %v558_v26  ;;  %v1980_v1 = vadd.f32 %v3258_v0, %v1966_v31 }
 0x72b   : > { %v1983_v11 = vadd.f32 %v3261_v39, %v1977_v35  ;;  %v560_v35 = vld [vmem:[%s3947_s22 + $0x4] ss:$0 sm:$0xff] }
 0x72c   : > { %1984 = vadd.xlane.f32.xlu0 %v1980_v1  ;;  %v1981_v38 = vadd.f32 %v3259_v23, %v1969_v29 }
 0x72e   : > { %1986 = vadd.xlane.f32.xlu1 %v1981_v38 }
 0x730   : > { %1988 = vadd.xlane.f32.xlu0 %v1982_v37 }
 0x734   : > { %1990 = vadd.xlane.f32.xlu0 %v1983_v11 }
 0x7b9   : > { %v1985_v13 = vpop.xlane.xlu0 %1984 }
 0x7ba   : > { %v1993_v15 = vmul.f32 0.0078125, %v1985_v13 }
 0x7bb   : > { %v1987_v50 = vpop.xlane.xlu1 %1986 }
 0x7bc   : > { %v4290_v51 = vsub.f32 %v1980_v1, %v1993_v15  ;;  %v1994_v54 = vmul.f32 0.0078125, %v1987_v50 }
 0x7bd   : > { %v1989_v55 = vpop.xlane.xlu0 %1988 }
 0x7be   : > { %v4292_v18 = vsub.f32 %v1981_v38, %v1994_v54  ;;  %v1995_v57 = vmul.f32 0.0078125, %v1989_v55  ;;  %v2001_v30 = vmul.f32 %v4290_v51, %v4290_v51 }
 0x7c0   : > { %v4296_v58 = vsub.f32 %v1982_v37, %v1995_v57  ;;  %2005 = vadd.xlane.f32.xlu1 %v2001_v30  ;;  %v2002_v60 = vmul.f32 %v4292_v18, %v4292_v18 }
 0x7c1   : > { %v1991_v36 = vpop.xlane.xlu0 %1990 }
 0x7c2   : > { %v1996_v8 = vmul.f32 0.0078125, %v1991_v36  ;;  %2007 = vadd.xlane.f32.xlu0 %v2002_v60  ;;  %v2003_v62 = vmul.f32 %v4296_v58, %v4296_v58  ;;  %v3173_v60 = vld [vmem:[%s3945_s2 + $0x28] sm:$0xff]   ;;  %v3174_v36 = vld [vmem:[%s3945_s2 + $0x70] sm:$0xff]  }
 0x7c3   : > { %2822 = vmatpush3.bf16.msra.mxu1 %v3173_v60 }
 0x7c4   : > { %v4302_v63 = vsub.f32 %v1983_v11, %v1996_v8  ;;  %2009 = vadd.xlane.f32.xlu1 %v2003_v62  ;;  %v3175_v8 = vld [vmem:[%s3945_s2 + $0x30] sm:$0xff]   ;;  %2823 = vmatprep.subr.bf16.mxu1 %v3174_v36  ;;  %v3176_v62 = vld [vmem:[%s3945_s2 + $0x78] sm:$0xff]  }
 0x7c6   : > { %v2004_v25 = vmul.f32 %v4302_v63, %v4302_v63 }
 0x7c7   : > { %2824 = vmatpush3.bf16.msra.mxu1 %v3175_v8 }
 0x7c8   : > { %2011 = vadd.xlane.f32.xlu0 %v2004_v25  ;;  %2825 = vmatprep.subr.bf16.mxu1 %v3176_v62  ;;  %v2670_v25 = vld [vmem:[%s3947_s22 + $0x1] ss:$8 sm:$0x3] }
 0x7c9   : > { %v2063_v2 = vrot.slane %v2670_v25, %v3991_v46 }
 0x84d   : > { %v2006_v24 = vpop.xlane.xlu1 %2005 }
 0x84e   : > { %v2013_v26 = vmul.f32 0.0078125, %v2006_v24 }
 0x84f   : > { %v2008_v27 = vpop.xlane.xlu0 %2007 }
 0x850   : > { %v2017_v34 = vadd.f32 1e-05, %v2013_v26  ;;  %v2014_v31 = vmul.f32 0.0078125, %v2008_v27 }
 0x851   : > { %v2010_v33 = vpop.xlane.xlu1 %2009 }
 0x852   : > { %3242 = vrsqrt.f32 %v2017_v34  ;;  %v2018_v17 = vadd.f32 1e-05, %v2014_v31  ;;  %v2015_v28 = vmul.f32 0.0078125, %v2010_v33  ;;  %v559_v33 = vld [vmem:[%s3947_s22 + $0x3] ss:$0 sm:$0xff] }
 0x854   : > { %3244 = vrsqrt.f32 %v2018_v17  ;;  %v2019_v29 = vadd.f32 1e-05, %v2015_v28 }
 0x855   : > { %v2012_v0 = vpop.xlane.xlu0 %2011 }
 0x856   : > { %3246 = vrsqrt.f32 %v2019_v29  ;;  %v2016_v1 = vmul.f32 0.0078125, %v2012_v0 }
 0x858   : > { %v2020_v23 = vadd.f32 1e-05, %v2016_v1 }
 0x85a   : > { %3248 = vrsqrt.f32 %v2020_v23 }
 0x85c   : > { %v3243_v38 = vpop.eup %3242 }
 0x85d   : > { %v2025_v3 = vmul.f32 %v3243_v38, %v4290_v51 }
 0x85e   : > { %v3245_v37 = vpop.eup %3244 }
 0x85f   : > { %v2026_v39 = vmul.f32 %v3245_v37, %v4292_v18  ;;  %v2029_v11 = vmul.f32 %v2025_v3, %v560_v35 }
 0x860   : > { %v3247_v42 = vpop.eup %3246 }
 0x861   : > { %v2030_v43 = vmul.f32 %v2026_v39, %v560_v35  ;;  %v4333_v47 = vadd.f32 %v2029_v11, %v561_v21  ;;  %v2027_v15 = vmul.f32 %v3247_v42, %v4296_v58 }
 0x863   : > { %v4335_v13 = vadd.f32 %v2030_v43, %v561_v21  ;;  %v2031_v55 = vmul.f32 %v2027_v15, %v560_v35 }
 0x864   : > { %v3249_v50 = vpop.eup %3248 }
 0x865   : > { %v2037_v51 = vpack.c.bf16 %v4335_v13, %v4333_v47  ;;  %v2028_v54 = vmul.f32 %v3249_v50, %v4302_v63  ;;  %v4344_v30 = vadd.f32 %v2031_v55, %v561_v21  ;;  %v3177_v63 = vld [vmem:[%s3945_s2 + $0x38] sm:$0xff]  }
 0x866   : > { %2826 = vmatpush3.bf16.msra.mxu1 %v3177_v63 }
 0x867   : > { %2179 = vmatmul.mubr.bf16.vlgmr.msra.gmra.mrb[44].mxu0 %v2037_v51  ;;  %v2032_v18 = vmul.f32 %v2028_v54, %v560_v35 }
 0x868   : > { %2188 = vmatprep.mubr.bf16.mxu0 %v3571_v12  ;;  %v2059_v12 = vrot.slane %v2670_v25, %v3985_v44 }
 0x869   : > { %v4342_v57 = vadd.f32 %v2032_v18, %v561_v21 }
 0x86b   : > { %v2038_v58 = vpack.c.bf16 %v4342_v57, %v4344_v30 }
 0x86f   : > { %2189 = vmatmul.mubr.bf16.gmra.mrb[48].mxu0 %v2038_v58 }
 0x93a   : > { %v2180_v52 = vpop.f32.mrb[44].mxu0 }
 0x93b   : > { %v2181_v40 = vadd.f32 %v2180_v52, %v2059_v12  ;;  %v2182_v48 = vpop.f32.mrb[45].mxu0 }
 0x93c   : > { %v2183_v4 = vadd.f32 %v2182_v48, %v2063_v2  ;;  %v2184_v5 = vpop.f32.mrb[46].mxu0 }
 0x93d   : > { %v2185_v6 = vadd.f32 %v2184_v5, %v2059_v12  ;;  %v2186_v9 = vpop.f32.mrb[47].mxu0  ;;  %v2199_v10 = vmax.f32 %v2181_v40, 0.0 }
 0x93e   : > { %v2187_v32 = vadd.f32 %v2186_v9, %v2063_v2  ;;  %v2200_v14 = vmax.f32 %v2183_v4, 0.0 }
 0x93f   : > { %v2201_v41 = vmax.f32 %v2185_v6, 0.0 }
 0x940   : > { %v2202_v61 = vmax.f32 %v2187_v32, 0.0 }
 0x941   : > { %v2207_v56 = vpack.c.bf16 %v2201_v41, %v2199_v10 }
 0x942   : > { %v2208_v16 = vpack.c.bf16 %v2202_v61, %v2200_v14  ;;  %v2190_v53 = vpop.f32.mrb[48].mxu0 }
 0x943   : > { %v2191_v59 = vadd.f32 %v2190_v53, %v2059_v12  ;;  %v2192_v7 = vpop.f32.mrb[49].mxu0  ;;  %v562_v53 = vld [vmem:[%s3947_s22 + $0x6] ss:$0 sm:$0xff] }
 0x944   : > { %v2193_v44 = vadd.f32 %v2192_v7, %v2063_v2  ;;  %v2194_v46 = vpop.f32.mrb[50].mxu0  ;;  %2371 = vmatprep.mubr.bf16.mxu1 %v2208_v16 }
 0x945   : > { %v2195_v49 = vadd.f32 %v2194_v46, %v2059_v12  ;;  %v2196_v19 = vpop.f32.mrb[51].mxu0  ;;  %2372 = vmatmul.mubr.bf16.vlgmr.msra.gmra.mrb[36].mxu1 %v2207_v56  ;;  %v2203_v22 = vmax.f32 %v2191_v59, 0.0 }
 0x946   : > { %v2197_v20 = vadd.f32 %v2196_v19, %v2063_v2  ;;  %v2204_v24 = vmax.f32 %v2193_v44, 0.0  ;;  %v563_v44 = vld [vmem:[%s3947_s22 + $0x7] ss:$0 sm:$0xff] }
 0x947   : > { %v2205_v45 = vmax.f32 %v2195_v49, 0.0 }
 0x948   : > { %v2206_v26 = vmax.f32 %v2197_v20, 0.0 }
 0x949   : > { %v2209_v27 = vpack.c.bf16 %v2205_v45, %v2203_v22 }
 0x94a   : > { %v2210_v34 = vpack.c.bf16 %v2206_v26, %v2204_v24 }
 0x94c   : > { %2379 = vmatprep.mubr.bf16.mxu1 %v2210_v34 }
 0x94d   : > { %2380 = vmatmul.mubr.bf16.gmra.mrb[40].mxu1 %v2209_v27 }
 0xa18   : > { %v2827_v31 = vpop.f32.mrb[36].mxu1 }
 0xa19   : > { %v2828_v17 = vpop.f32.mrb[37].mxu1 }
 0xa1a   : > { %v2829_v28 = vadd.f32 %v2828_v17, %v2827_v31  ;;  %v2830_v29 = vpop.f32.mrb[38].mxu1 }
 0xa1b   : > { %v2831_v0 = vpop.f32.mrb[39].mxu1 }
 0xa1c   : > { %v2374_v1 = vadd.f32 %v2829_v28, %v559_v33  ;;  %v2832_v23 = vadd.f32 %v2831_v0, %v2830_v29 }
 0xa1e   : > { %v2377_v38 = vadd.f32 %v2832_v23, %v559_v33  ;;  %v2388_v35 = vadd.f32 %v2374_v1, %v4333_v47 }
 0xa20   : > { %v2833_v3 = vpop.f32.mrb[40].mxu1  ;;  %2392 = vadd.xlane.f32.xlu1 %v2388_v35  ;;  %v2389_v37 = vadd.f32 %v2377_v38, %v4335_v13 }
 0xa21   : > { %v2834_v39 = vpop.f32.mrb[41].mxu1 }
 0xa22   : > { %v2835_v11 = vadd.f32 %v2834_v39, %v2833_v3  ;;  %v2836_v42 = vpop.f32.mrb[42].mxu1  ;;  %2394 = vadd.xlane.f32.xlu0 %v2389_v37 }
 0xa23   : > { %v2837_v21 = vpop.f32.mrb[43].mxu1 }
 0xa24   : > { %v2382_v43 = vadd.f32 %v2835_v11, %v559_v33  ;;  %v2838_v15 = vadd.f32 %v2837_v21, %v2836_v42 }
 0xa26   : > { %v2385_v50 = vadd.f32 %v2838_v15, %v559_v33  ;;  %v2390_v51 = vadd.f32 %v2382_v43, %v4344_v30 }
 0xa28   : > { %2396 = vadd.xlane.f32.xlu1 %v2390_v51  ;;  %v2391_v54 = vadd.f32 %v2385_v50, %v4342_v57 }
 0xa2a   : > { %2398 = vadd.xlane.f32.xlu0 %v2391_v54 }
 0xaad   : > { %v2393_v55 = vpop.xlane.xlu1 %2392 }
 0xaae   : > { %v2400_v47 = vmul.f32 0.0078125, %v2393_v55 }
 0xaaf   : > { %v2395_v18 = vpop.xlane.xlu0 %2394 }
 0xab0   : > { %v2404_v58 = vsub.f32 %v2388_v35, %v2400_v47  ;;  %v2401_v60 = vmul.f32 0.0078125, %v2395_v18 }
 0xab2   : > { %v2405_v13 = vsub.f32 %v2389_v37, %v2401_v60  ;;  %v2408_v36 = vmul.f32 %v2404_v58, %v2404_v58 }
 0xab4   : > { %2412 = vadd.xlane.f32.xlu1 %v2408_v36  ;;  %v2409_v8 = vmul.f32 %v2405_v13, %v2405_v13 }
 0xab5   : > { %v2397_v62 = vpop.xlane.xlu1 %2396 }
 0xab6   : > { %v2402_v63 = vmul.f32 0.0078125, %v2397_v62  ;;  %2414 = vadd.xlane.f32.xlu0 %v2409_v8 }
 0xab7   : > { %v2399_v25 = vpop.xlane.xlu0 %2398 }
 0xab8   : > { %v2406_v12 = vsub.f32 %v2390_v51, %v2402_v63  ;;  %v2403_v2 = vmul.f32 0.0078125, %v2399_v25 }
 0xaba   : > { %v2407_v30 = vsub.f32 %v2391_v54, %v2403_v2  ;;  %v2410_v52 = vmul.f32 %v2406_v12, %v2406_v12 }
 0xabc   : > { %2416 = vadd.xlane.f32.xlu1 %v2410_v52  ;;  %v2411_v57 = vmul.f32 %v2407_v30, %v2407_v30 }
 0xabe   : > { %2418 = vadd.xlane.f32.xlu0 %v2411_v57 }
 0xb41   : > { %v2413_v40 = vpop.xlane.xlu1 %2412 }
 0xb42   : > { %v2420_v48 = vmul.f32 0.0078125, %v2413_v40 }
 0xb43   : > { %v2415_v4 = vpop.xlane.xlu0 %2414 }
 0xb44   : > { %v2424_v5 = vadd.f32 1e-05, %v2420_v48  ;;  %v2421_v6 = vmul.f32 0.0078125, %v2415_v4 }
 0xb46   : > { %3250 = vrsqrt.f32 %v2424_v5  ;;  %v2425_v9 = vadd.f32 1e-05, %v2421_v6 }
 0xb48   : > { %3252 = vrsqrt.f32 %v2425_v9 }
 0xb49   : > { %v2417_v32 = vpop.xlane.xlu1 %2416 }
 0xb4a   : > { %v2422_v10 = vmul.f32 0.0078125, %v2417_v32 }
 0xb4b   : > { %v2419_v41 = vpop.xlane.xlu0 %2418 }
 0xb4c   : > { %v2426_v14 = vadd.f32 1e-05, %v2422_v10  ;;  %v2423_v61 = vmul.f32 0.0078125, %v2419_v41 }
 0xb4e   : > { %3254 = vrsqrt.f32 %v2426_v14  ;;  %v2427_v56 = vadd.f32 1e-05, %v2423_v61 }
 0xb50   : > { %v3251_v16 = vpop.eup %3250  ;;  %3256 = vrsqrt.f32 %v2427_v56 }
 0xb51   : > { %v2432_v59 = vmul.f32 %v3251_v16, %v2404_v58 }
 0xb52   : > { %v3253_v7 = vpop.eup %3252 }
 0xb53   : > { %v2436_v46 = vmul.f32 %v2432_v59, %v562_v53  ;;  %v2433_v49 = vmul.f32 %v3253_v7, %v2405_v13 }
 0xb55   : > { %v2440_v19 = vadd.f32 %v2436_v46, %v563_v44  ;;  %v2437_v20 = vmul.f32 %v2433_v49, %v562_v53 }
 0xb57   : > { %2444 = vst [vmem:[#allocation2] sm:$0xff] %v2440_v19  ;;  %v2441_v22 = vadd.f32 %v2437_v20, %v563_v44  ;;  %2452 = vst [vmem:[#allocation13] sm:$0xff] (!%p2751_p5), %v2440_v19 }
 0xb58   : > { %v3255_v45 = vpop.eup %3254 }
 0xb59   : > { %2445 = vst [vmem:[#allocation2 + $0x8] sm:$0xff] %v2441_v22  ;;  %v2434_v24 = vmul.f32 %v3255_v45, %v2406_v12  ;;  %2453 = vst [vmem:[#allocation13 + $0x8] sm:$0xff] (!%p2751_p5), %v2441_v22 }
 0xb5a   : > { %v3257_v26 = vpop.eup %3256 }
 0xb5b   : > { %v2438_v27 = vmul.f32 %v2434_v24, %v562_v53  ;;  %v2435_v34 = vmul.f32 %v3257_v26, %v2407_v30  ;;  %2451 = sbr.rel (%p2751_p5) target bundleno = 2914 (0xb62), region = 88 }
 0xb5d   : > { %v2442_v31 = vadd.f32 %v2438_v27, %v563_v44  ;;  %v2439_v33 = vmul.f32 %v2435_v34, %v562_v53 }
 0xb5f   : > { %2446 = vst [vmem:[#allocation2 + $0x10] sm:$0xff] %v2442_v31  ;;  %v2443_v17 = vadd.f32 %v2439_v33, %v563_v44  ;;  %2454 = vst [vmem:[#allocation13 + $0x10] sm:$0xff] (!%p2751_p5), %v2442_v31 }
 0xb61   : > { %2447 = vst [vmem:[#allocation2 + $0x18] sm:$0xff] %v2443_v17  ;;  %2455 = vst [vmem:[#allocation13 + $0x18] sm:$0xff] (!%p2751_p5), %v2443_v17 }
 0xb62 PF: > { %p3031_p11 = scmp.eq.s32.totalorder %s3654_s11, 1  ;;  %s3577_s16 = smov [#allocation13]  }
 0xb63   : > { %s2466_s21 = sshll.u32 %s3577_s16, 4  ;;  %s2467_s21 = int_to_ptr.vmem [resolvable:$true] %s2466_s21 }
 0xb64   : > { %s3468_s3 = scalar_lea.vmem %s2467_s21, 512  ;;  %p3475_p0 = scmp.lt.s32.totalorder %s2467_s21, %s2467_s21 }
 0xb65   : > { %p3469_p4 = scmp.ne.s32.totalorder %s2467_s21, %s3468_s3  ;;  %p3476_p2 = scmp.lt.s32.totalorder %s3468_s3, %s3468_s3 }
 0xb67   : > { %p3470_p12 = pnand %p3469_p4, %p3031_p11  ;;  %p3477_p9 = por %p3476_p2, %p3475_p0 }
 0xb69   : > { %p3471_p7 = pneg %p3470_p12 }
 0xb6b   : > { %p3478_p13 = pnand %p3477_p9, %p3471_p7 }
 0xb6d   : > { %3481 = shalt.err (!%p3478_p13)
}
 0xb6e   : > { %s4470_s23 = sld [smem:[#allocation27_spill]] }
 0xb74   : > { %s3482_s27 = scalar_lea.hbm %s4470_s23, 512 }
 0xb75   : > { %p3483_p10 = scmp.ne.s32.totalorder %s4470_s23, %s3482_s27  ;;  %p3488_p3 = scmp.lt.u32.totalorder %s3482_s27, %s4470_s23 }
 0xb77   : > { %p3484_p6 = pnand %p3483_p10, %p3031_p11 }
 0xb79   : > { %p3485_p8 = pneg %p3484_p6 }
 0xb7b   : > { %p3490_p1 = pnand %p3488_p3, %p3485_p8 }
 0xb7d   : > { %3493 = shalt.err (!%p3490_p1)
}
 0xb7e   : > { %s3578_s12 = smov 128   ;;  %s3579_s24 = smov 8  }
 0xb7f   : > { %3000 = dma.vmem_to_hbm [thread:$0]  (%p3031_p11), %s2467_s21, 512, %s4470_s23, [#allocation5], %s3578_s12, %s3578_s12, %s3579_s24  }
 0xb80   : > { %3531 = dma.done.wait (%p3031_p11), [#allocation5], 512  }
 0xb81   : > { %3533 = vsyncadd (%p3031_p11), [#allocation5], 4294966784 }
 0xb82 PF: > { %s21_s10 = sadd.s32 1, %s3556_s10   ;;  %s4471_s6 = sld [smem:[#allocation18_spill]] }
 0xb83   : > { %p18_p5 = scmp.ge.s32.totalorder %s21_s10, 4   ;;  %s4472_s29 = sld [smem:[#allocation20_spill]] }
 0xb84   : > { %s4473_s2 = sld [smem:[#allocation19_spill]]  ;;  %s4474_s27 = smov %s3540_s28 }
 0xb85   : > { %s4476_s30 = smov %s3552_s9  ;;  %20 = sbr.rel (!%p18_p5) target bundleno = 13 (0xd), region = 154 }
 0xb88   : > { %s4475_s28 = smov %s4471_s6 }
 0xb8a   : > { %s4477_s9 = smov %s4473_s2 }
 0xb8c   :  { %2482 = vsyncpa [#allocation4], 1 }
 0xb8d   :  { %2484 = vsyncpa [#allocation4 + $0x1], 1 }
 0xb8e   :  { %2485 = vsyncpa [#allocation7], 1 }
 0xb8f   :  { %2486 = vsyncpa [#allocation5], 1 }
 0xb90   :  { %2488 = vsyncpa [#allocation5 + $0x1], 1 }

</bundles_post_ra>
